<compile_context>
chip_gen: v7x
topology: tpu7x:2x2x1
jax: 0.10.0
libtpu: 0.0.40
codegen_flags: <defaults>
</compile_context>

<pallas_src>
import functools

import jax
import jax.numpy as jnp
from jax import lax
from jax.experimental import pallas as pl
from jax.experimental.pallas import tpu as pltpu

LANES = 128  # TPU vreg lane width


def _ceil_to(n, m):
    return ((n + m - 1) // m) * m


# ---------------------------------------------------------------------------
# Parameter packing: fold conv+l1, zero-pad hidden/action dims to the lane
# width, and lay every tensor out in one (rows, 128) f32 slab with each piece
# starting on a sublane-aligned (multiple-of-8) row.
# ---------------------------------------------------------------------------
def pack_params(p):
    w_lat, b_lat = p["w_lat"], p["b_lat"]      # (F, H), (1, H)
    w_cnn, b_cnn = p["w_cnn"], p["b_cnn"]      # (C, S), (C, 1)
    w1, b1 = p["w1"], p["b1"]                  # (C, C), (C, 1)
    w2, b2 = p["w2"], p["b2"]                  # (1, C), (1, 1)
    w_out, b_out = p["w_out"], p["b_out"]      # (H, A), (1, A)

    F, H = w_lat.shape
    C, S = w_cnn.shape
    A = w_out.shape[1]
    assert H <= LANES and A <= LANES and S + 1 <= LANES and C + 1 <= LANES

    # Fold conv1d(k=1) followed (after the permute) by l1 -- no nonlinearity
    # between them:  a = relu(w1 @ (w_cnn @ h + b_cnn) + b1) = relu(W1c@h + b1c)
    w1c = (w1 @ w_cnn).astype(jnp.float32)                # (C, S)
    b1c = (w1 @ b_cnn + b1).astype(jnp.float32)           # (C, 1)

    rows = {}
    r = 0

    def take(name, nrows):
        nonlocal r
        rows[name] = r
        r = _ceil_to(r + nrows, 8)

    take("w_lat", F)       # cols [0:H]  (hidden zero-padded to 128 lanes)
    take("b_lat", 1)       # cols [0:H]
    take("w1c", C)         # cols [0:S] = W1c, col S = b1c
    take("w2", 1)          # cols [0:C] = w2,  col C = b2
    take("w_out", LANES)   # hidden zero-padded to 128 rows, cols [0:A]
    take("b_out", 1)       # cols [0:A]
    R = _ceil_to(r, 8)

    f32 = jnp.float32
    slab = jnp.zeros((R, LANES), f32)
    slab = slab.at[rows["w_lat"]:rows["w_lat"] + F, :H].set(w_lat.astype(f32))
    slab = slab.at[rows["b_lat"], :H].set(b_lat[0].astype(f32))
    slab = slab.at[rows["w1c"]:rows["w1c"] + C, :S].set(w1c)
    slab = slab.at[rows["w1c"]:rows["w1c"] + C, S].set(b1c[:, 0])
    slab = slab.at[rows["w2"], :C].set(w2[0].astype(f32))
    slab = slab.at[rows["w2"], C].set(b2[0, 0].astype(f32))
    slab = slab.at[rows["w_out"]:rows["w_out"] + H, :A].set(w_out.astype(f32))
    slab = slab.at[rows["b_out"], :A].set(b_out[0].astype(f32))

    meta = dict(rows=rows, R=R, F=F, S=S, C=C, A=A, Ap=LANES)
    return slab, meta


# ---------------------------------------------------------------------------
# Kernels
# ---------------------------------------------------------------------------
def _slab_views(p_ref, meta):
    r, F, S, C = meta["rows"], meta["F"], meta["S"], meta["C"]
    w_lat = p_ref[r["w_lat"]:r["w_lat"] + F, :]            # (F, 128)
    b_lat = p_ref[r["b_lat"]:r["b_lat"] + 1, :]            # (1, 128)
    w1c = p_ref[r["w1c"]:r["w1c"] + C, :S]                 # (C, S)  folded conv+l1
    b1c = p_ref[r["w1c"]:r["w1c"] + C, S:S + 1]            # (C, 1)
    w2 = p_ref[r["w2"]:r["w2"] + 1, :C]                    # (1, C)
    b2 = p_ref[r["w2"]:r["w2"] + 1, C:C + 1]               # (1, 1)
    w_out = p_ref[r["w_out"]:r["w_out"] + LANES, :]        # (128, 128) zero-padded
    b_out = p_ref[r["b_out"]:r["b_out"] + 1, :]            # (1, 128)
    return w_lat, b_lat, w1c, b1c, w2, b2, w_out, b_out


def _dot_last(lhs, rhs):
    # Contract the LHS's last dim with the RHS's first dim: collapses to one
    # (prod(leading), K) @ (K, N) MXU matmul.
    return lax.dot_general(lhs, rhs, (((lhs.ndim - 1,), (0,)), ((), ())),
                           preferred_element_type=jnp.float32)


def _dot_left(w, act):
    # (M, K) @ (K, ...) -> (M, ...): one MXU matmul, lane-dense N.
    return lax.dot_general(w, act, (((1,), (0,)), ((), ())),
                           preferred_element_type=jnp.float32)


def dqn_kernel_fused(x_ref, p_ref, o_ref, *, meta):
    """Preferred layout.  x_ref: (S, tb, F) batch tile, o_ref: (1, tb, 128)."""
    w_lat, b_lat, w1c, b1c, w2, b2, w_out, b_out = _slab_views(p_ref, meta)
    # latent: relu(x @ W_lat + b_lat)               -> (S, tb, 128)
    h = jnp.maximum(_dot_last(x_ref[...], w_lat) + b_lat[None], 0.0)
    # folded conv1d(k=1) + l1: relu(W1c @ h + b1c)  -> (C, tb, 128)
    a = jnp.maximum(_dot_left(w1c, h) + b1c[:, :, None], 0.0)
    # l2: relu(w2 @ a + b2)                         -> (1, tb, 128)
    z = jnp.maximum(_dot_left(w2, a) + b2[:, :, None], 0.0)
    # output layer; lane-dense (128-wide) slab store -> (1, tb, 128)
    o_ref[...] = _dot_last(z, w_out) + b_out[None]


def dqn_kernel_batched(x_ref, p_ref, o_ref, *, meta):
    """Fallback (v2-proven dot forms).  x_ref: (tb, S, F), o_ref: (tb, 1, 128)."""
    tb = x_ref.shape[0]
    w_lat, b_lat, w1c, b1c, w2, b2, w_out, b_out = _slab_views(p_ref, meta)

    def bmm(w, act):   # 'js,bsk->bjk' with the tiny weight broadcast over the tile
        wb = jnp.broadcast_to(w[None], (tb,) + w.shape)
        return lax.dot_general(wb, act, (((2,), (1,)), ((0,), (0,))),
                               preferred_element_type=jnp.float32)

    h = jnp.maximum(_dot_last(x_ref[...], w_lat) + b_lat[None], 0.0)   # (tb, S, 128)
    a = jnp.maximum(bmm(w1c, h) + b1c[None], 0.0)                      # (tb, C, 128)
    z = jnp.maximum(bmm(w2, a) + b2[None], 0.0)                        # (tb, 1, 128)
    o_ref[...] = _dot_last(z, w_out) + b_out[None]                     # (tb, 1, 128)


# ---------------------------------------------------------------------------
# Wrapper
# ---------------------------------------------------------------------------
def dqn_forward(x, slab, meta, *, batch_tile=256, mode="auto"):
    """x: (B, S, F) float32 -> (B, n_actions).  mode: "auto" | "fused" | "batched"."""
    B, S, F = x.shape
    A, Ap, R = meta["A"], meta["Ap"], meta["R"]
    assert S == meta["S"] and F == meta["F"]

    # 8-row-aligned batch tile; 256 examples/tile => 2048 flattened rows into
    # the latent MXU matmul per grid step while the double-buffered working
    # set stays ~3 MiB (comfortable under v7x's 64 MiB / 32 MiB-scoped VMEM).
    tb = min(_ceil_to(B, 8), batch_tile)
    b_pad = _ceil_to(B, tb)
    nb = b_pad // tb

    cparams = pltpu.CompilerParams(dimension_semantics=("parallel",))
    p_spec = pl.BlockSpec((R, LANES), lambda i: (0, 0))   # resident weight slab

    def run_fused():
        xt = jnp.transpose(x, (1, 0, 2)).astype(jnp.float32)        # (S, B, F)
        xt = jnp.pad(xt, ((0, 0), (0, b_pad - B), (0, 0)))
        out = pl.pallas_call(
            functools.partial(dqn_kernel_fused, meta=meta),
            out_shape=jax.ShapeDtypeStruct((1, b_pad, Ap), jnp.float32),
            grid=(nb,),
            in_specs=[pl.BlockSpec((S, tb, F), lambda i: (0, i, 0)), p_spec],
            out_specs=pl.BlockSpec((1, tb, Ap), lambda i: (0, i, 0)),
            compiler_params=cparams,
        )(xt, slab)
        return out.reshape(b_pad, Ap)[:B, :A]

    def run_batched():
        xb = jnp.pad(x.astype(jnp.float32), ((0, b_pad - B), (0, 0), (0, 0)))
        out = pl.pallas_call(
            functools.partial(dqn_kernel_batched, meta=meta),
            out_shape=jax.ShapeDtypeStruct((b_pad, 1, Ap), jnp.float32),
            grid=(nb,),
            in_specs=[pl.BlockSpec((tb, S, F), lambda i: (i, 0, 0)), p_spec],
            out_specs=pl.BlockSpec((tb, 1, Ap), lambda i: (i, 0, 0)),
            compiler_params=cparams,
        )(xb, slab)
        return out.reshape(b_pad, Ap)[:B, :A]

    if mode == "fused":
        return run_fused()
    if mode == "batched":
        return run_batched()
    try:
        return run_fused()
    except Exception:
        # Installed Pallas lowering rejected the 2D-LHS x 3D-RHS contraction;
        # use the batched dot form that compiled cleanly in v2.
        return run_batched()


# ---------------------------------------------------------------------------
# Reference + init
# ---------------------------------------------------------------------------
def dqn_reference(x, p):
    """Pure-JAX reference of the original (unfolded, unpadded) math."""
    h = jax.nn.relu(x @ p["w_lat"] + p["b_lat"])                       # (B,S,H)
    c = jnp.einsum("os,bsh->boh", p["w_cnn"], h) + p["b_cnn"]          # (B,10,H)
    a = jax.nn.relu(jnp.einsum("ji,bih->bjh", p["w1"], c) + p["b1"])   # (B,10,H)
    z = jax.nn.relu(jnp.einsum("oj,bjh->boh", p["w2"], a) + p["b2"])   # (B,1,H)
    return z[:, 0, :] @ p["w_out"] + p["b_out"]                        # (B,A)


def init_params(key, n_feature, seq_len, hidden_size, n_actions):
    ks = jax.random.split(key, 10)
    f32 = jnp.float32
    s = 0.1
    return {
        # latent: Linear(n_feature, hidden), stored transposed -> (in, out)
        "w_lat": (jax.random.normal(ks[0], (n_feature, hidden_size)) * s).astype(f32),
        "b_lat": (jax.random.normal(ks[1], (1, hidden_size)) * s).astype(f32),
        # cnn: Conv1d(seq_len, 10, k=1) -> torch weight (10, seq_len, 1) stored (10, seq_len)
        "w_cnn": (jax.random.normal(ks[2], (10, seq_len)) * s).astype(f32),
        "b_cnn": (jax.random.normal(ks[3], (10, 1)) * s).astype(f32),
        # l1: Linear(10, 10), torch (out, in) layout (applied from the left)
        "w1": (jax.random.normal(ks[4], (10, 10)) * s).astype(f32),
        "b1": (jax.random.normal(ks[5], (10, 1)) * s).astype(f32),
        # l2: Linear(10, 1), torch (out, in) = (1, 10)
        "w2": (jax.random.normal(ks[6], (1, 10)) * s).astype(f32),
        "b2": (jax.random.normal(ks[7], (1, 1)) * s).astype(f32),
        # output_layer: Linear(hidden, n_actions), stored transposed -> (in, out)
        "w_out": (jax.random.normal(ks[8], (hidden_size, n_actions)) * s).astype(f32),
        "b_out": (jax.random.normal(ks[9], (1, n_actions)) * s).astype(f32),
    }


if __name__ == "__main__":
    B, S, F, H, A = 2, 8, 16, 32, 4   # batch, seq_len, n_feature, hidden, n_actions

    key = jax.random.PRNGKey(0)
    kx, kp = jax.random.split(key)
    x = jax.random.normal(kx, (B, S, F), dtype=jnp.float32)
    params = init_params(kp, n_feature=F, seq_len=S, hidden_size=H, n_actions=A)

    slab, meta = pack_params(params)
    out = jax.block_until_ready(dqn_forward(x, slab, meta))

    ref = dqn_reference(x, params)
    # matches torch's x.squeeze() for B > 1 and n_actions > 1
    assert out.shape == (B, A), out.shape
    assert jnp.allclose(out, ref, atol=1e-5, rtol=1e-5), (out, ref)

    print("KERNEL_OK")
</pallas_src>

<mosaic_0001>
module attributes {stable_mosaic.version = 11 : i64} {
  func.func @dqn_kernel_fused(%arg0: i32, %arg1: memref<8x8x16xf32, #tpu.memory_space<vmem>>, %arg2: memref<184x128xf32, #tpu.memory_space<vmem>>, %arg3: memref<1x8x128xf32, #tpu.memory_space<vmem>>) attributes {dimension_semantics = [#tpu.dimension_semantics<parallel>], iteration_bounds = array<i64: 1>, scalar_prefetch = 0 : i64, scratch_operands = 0 : i64, tpu.core_type = #tpu.core_type<tc>, window_params = [{transform_indices = @transform_0, window_bounds = array<i64: 8, 8, 16>}, {pipeline_mode = #tpu.pipeline_mode<synchronous>, transform_indices = @transform_1, window_bounds = array<i64: 184, 128>}, {transform_indices = @transform_2, window_bounds = array<i64: 1, 8, 128>}]} {
    %c0 = arith.constant 0 : index
    %c0_0 = arith.constant 0 : index
    %0 = vector.load %arg2[%c0, %c0_0] : memref<184x128xf32, #tpu.memory_space<vmem>>, vector<16x128xf32>
    %c16 = arith.constant 16 : index
    %c0_1 = arith.constant 0 : index
    %1 = vector.load %arg2[%c16, %c0_1] : memref<184x128xf32, #tpu.memory_space<vmem>>, vector<1x128xf32>
    %c24 = arith.constant 24 : index
    %c0_2 = arith.constant 0 : index
    %2 = vector.load %arg2[%c24, %c0_2] : memref<184x128xf32, #tpu.memory_space<vmem>>, vector<10x8xf32>
    %c24_3 = arith.constant 24 : index
    %c8 = arith.constant 8 : index
    %3 = vector.load %arg2[%c24_3, %c8] : memref<184x128xf32, #tpu.memory_space<vmem>>, vector<10x1xf32>
    %c40 = arith.constant 40 : index
    %c0_4 = arith.constant 0 : index
    %4 = vector.load %arg2[%c40, %c0_4] : memref<184x128xf32, #tpu.memory_space<vmem>>, vector<1x10xf32>
    %c40_5 = arith.constant 40 : index
    %c10 = arith.constant 10 : index
    %5 = vector.load %arg2[%c40_5, %c10] : memref<184x128xf32, #tpu.memory_space<vmem>>, vector<1x1xf32>
    %c48 = arith.constant 48 : index
    %c0_6 = arith.constant 0 : index
    %6 = vector.load %arg2[%c48, %c0_6] : memref<184x128xf32, #tpu.memory_space<vmem>>, vector<128x128xf32>
    %c176 = arith.constant 176 : index
    %c0_7 = arith.constant 0 : index
    %7 = vector.load %arg2[%c176, %c0_7] : memref<184x128xf32, #tpu.memory_space<vmem>>, vector<1x128xf32>
    %c0_8 = arith.constant 0 : index
    %c0_9 = arith.constant 0 : index
    %c0_10 = arith.constant 0 : index
    %8 = vector.load %arg1[%c0_8, %c0_9, %c0_10] : memref<8x8x16xf32, #tpu.memory_space<vmem>>, vector<8x8x16xf32>
    %cst = arith.constant dense<0.000000e+00> : vector<8x8x128xf32>
    %9 = tpu.matmul %8, %0, %cst {dimension_numbers = #tpu.dot_dimension_numbers<[2], [0], [0, 1], [1], [0, 0, 0, 1, 1, 1], [], []>} : vector<8x8x16xf32>, vector<16x128xf32>, vector<8x8x128xf32> -> vector<8x8x128xf32>
    %10 = vector.shape_cast %1 : vector<1x128xf32> to vector<1x1x128xf32>
    %11 = vector.broadcast %10 : vector<1x1x128xf32> to vector<8x8x128xf32>
    %12 = arith.addf %9, %11 : vector<8x8x128xf32>
    %cst_11 = arith.constant 0.000000e+00 : f32
    %13 = vector.broadcast %cst_11 : f32 to vector<8x8x128xf32>
    %14 = arith.maximumf %12, %13 : vector<8x8x128xf32>
    %cst_12 = arith.constant dense<0.000000e+00> : vector<10x8x128xf32>
    %15 = tpu.matmul %2, %14, %cst_12 {dimension_numbers = #tpu.dot_dimension_numbers<[1], [0], [0], [1, 2], [0, 0, 1, 1, 1, 2], [], []>} : vector<10x8xf32>, vector<8x8x128xf32>, vector<10x8x128xf32> -> vector<10x8x128xf32>
    %16 = vector.shape_cast %3 : vector<10x1xf32> to vector<10x1x1xf32>
    %17 = vector.broadcast %16 : vector<10x1x1xf32> to vector<10x8x128xf32>
    %18 = arith.addf %15, %17 : vector<10x8x128xf32>
    %cst_13 = arith.constant 0.000000e+00 : f32
    %19 = vector.broadcast %cst_13 : f32 to vector<10x8x128xf32>
    %20 = arith.maximumf %18, %19 : vector<10x8x128xf32>
    %cst_14 = arith.constant dense<0.000000e+00> : vector<1x8x128xf32>
    %21 = tpu.matmul %4, %20, %cst_14 {dimension_numbers = #tpu.dot_dimension_numbers<[1], [0], [0], [1, 2], [0, 0, 1, 1, 1, 2], [], []>} : vector<1x10xf32>, vector<10x8x128xf32>, vector<1x8x128xf32> -> vector<1x8x128xf32>
    %22 = vector.shape_cast %5 : vector<1x1xf32> to vector<1x1x1xf32>
    %23 = vector.broadcast %22 : vector<1x1x1xf32> to vector<1x8x128xf32>
    %24 = arith.addf %21, %23 : vector<1x8x128xf32>
    %cst_15 = arith.constant 0.000000e+00 : f32
    %25 = vector.broadcast %cst_15 : f32 to vector<1x8x128xf32>
    %26 = arith.maximumf %24, %25 : vector<1x8x128xf32>
    %cst_16 = arith.constant dense<0.000000e+00> : vector<1x8x128xf32>
    %27 = tpu.matmul %26, %6, %cst_16 {dimension_numbers = #tpu.dot_dimension_numbers<[2], [0], [0, 1], [1], [0, 0, 0, 1, 1, 1], [], []>} : vector<1x8x128xf32>, vector<128x128xf32>, vector<1x8x128xf32> -> vector<1x8x128xf32>
    %28 = vector.shape_cast %7 : vector<1x128xf32> to vector<1x1x128xf32>
    %29 = vector.broadcast %28 : vector<1x1x128xf32> to vector<1x8x128xf32>
    %30 = arith.addf %27, %29 : vector<1x8x128xf32>
    %c0_17 = arith.constant 0 : index
    %c0_18 = arith.constant 0 : index
    %c0_19 = arith.constant 0 : index
    %31 = vector.load %arg3[%c0_17, %c0_18, %c0_19] : memref<1x8x128xf32, #tpu.memory_space<vmem>>, vector<1x8x128xf32>
    tpu.vector_store %arg3[%c0_17, %c0_18, %c0_19], %30 {strides = array<i32>} : memref<1x8x128xf32, #tpu.memory_space<vmem>>, vector<1x8x128xf32>,
    return
  }
  func.func @transform_0(%arg0: i32) -> (i32, i32, i32) {
    %c0_i32 = arith.constant 0 : i32
    %c0_i32_0 = arith.constant 0 : i32
    %c0_i32_1 = arith.constant 0 : i32
    return %c0_i32, %arg0, %c0_i32_0 : i32, i32, i32
  }
  func.func @transform_1(%arg0: i32) -> (i32, i32) {
    %c0_i32 = arith.constant 0 : i32
    %c0_i32_0 = arith.constant 0 : i32
    %c0_i32_1 = arith.constant 0 : i32
    return %c0_i32, %c0_i32_0 : i32, i32
  }
  func.func @transform_2(%arg0: i32) -> (i32, i32, i32) {
    %c0_i32 = arith.constant 0 : i32
    %c0_i32_0 = arith.constant 0 : i32
    %c0_i32_1 = arith.constant 0 : i32
    return %c0_i32, %arg0, %c0_i32_0 : i32, i32, i32
  }
}

module attributes {stable_mosaic.version = 11 : i64} {
  func.func @dqn_kernel_batched(%arg0: i32, %arg1: memref<8x8x16xf32, #tpu.memory_space<vmem>>, %arg2: memref<184x128xf32, #tpu.memory_space<vmem>>, %arg3: memref<8x1x128xf32, #tpu.memory_space<vmem>>) attributes {dimension_semantics = [#tpu.dimension_semantics<parallel>], iteration_bounds = array<i64: 1>, scalar_prefetch = 0 : i64, scratch_operands = 0 : i64, tpu.core_type = #tpu.core_type<tc>, window_params = [{transform_indices = @transform_0, window_bounds = array<i64: 8, 8, 16>}, {pipeline_mode = #tpu.pipeline_mode<synchronous>, transform_indices = @transform_1, window_bounds = array<i64: 184, 128>}, {transform_indices = @transform_2, window_bounds = array<i64: 8, 1, 128>}]} {
    %c0 = arith.constant 0 : index
    %c0_0 = arith.constant 0 : index
    %0 = vector.load %arg2[%c0, %c0_0] : memref<184x128xf32, #tpu.memory_space<vmem>>, vector<16x128xf32>
    %c16 = arith.constant 16 : index
    %c0_1 = arith.constant 0 : index
    %1 = vector.load %arg2[%c16, %c0_1] : memref<184x128xf32, #tpu.memory_space<vmem>>, vector<1x128xf32>
    %c24 = arith.constant 24 : index
    %c0_2 = arith.constant 0 : index
    %2 = vector.load %arg2[%c24, %c0_2] : memref<184x128xf32, #tpu.memory_space<vmem>>, vector<10x8xf32>
    %c24_3 = arith.constant 24 : index
    %c8 = arith.constant 8 : index
    %3 = vector.load %arg2[%c24_3, %c8] : memref<184x128xf32, #tpu.memory_space<vmem>>, vector<10x1xf32>
    %c40 = arith.constant 40 : index
    %c0_4 = arith.constant 0 : index
    %4 = vector.load %arg2[%c40, %c0_4] : memref<184x128xf32, #tpu.memory_space<vmem>>, vector<1x10xf32>
    %c40_5 = arith.constant 40 : index
    %c10 = arith.constant 10 : index
    %5 = vector.load %arg2[%c40_5, %c10] : memref<184x128xf32, #tpu.memory_space<vmem>>, vector<1x1xf32>
    %c48 = arith.constant 48 : index
    %c0_6 = arith.constant 0 : index
    %6 = vector.load %arg2[%c48, %c0_6] : memref<184x128xf32, #tpu.memory_space<vmem>>, vector<128x128xf32>
    %c176 = arith.constant 176 : index
    %c0_7 = arith.constant 0 : index
    %7 = vector.load %arg2[%c176, %c0_7] : memref<184x128xf32, #tpu.memory_space<vmem>>, vector<1x128xf32>
    %c0_8 = arith.constant 0 : index
    %c0_9 = arith.constant 0 : index
    %c0_10 = arith.constant 0 : index
    %8 = vector.load %arg1[%c0_8, %c0_9, %c0_10] : memref<8x8x16xf32, #tpu.memory_space<vmem>>, vector<8x8x16xf32>
    %cst = arith.constant dense<0.000000e+00> : vector<8x8x128xf32>
    %9 = tpu.matmul %8, %0, %cst {dimension_numbers = #tpu.dot_dimension_numbers<[2], [0], [0, 1], [1], [0, 0, 0, 1, 1, 1], [], []>} : vector<8x8x16xf32>, vector<16x128xf32>, vector<8x8x128xf32> -> vector<8x8x128xf32>
    %10 = vector.shape_cast %1 : vector<1x128xf32> to vector<1x1x128xf32>
    %11 = vector.broadcast %10 : vector<1x1x128xf32> to vector<8x8x128xf32>
    %12 = arith.addf %9, %11 : vector<8x8x128xf32>
    %cst_11 = arith.constant 0.000000e+00 : f32
    %13 = vector.broadcast %cst_11 : f32 to vector<8x8x128xf32>
    %14 = arith.maximumf %12, %13 : vector<8x8x128xf32>
    %15 = vector.shape_cast %2 : vector<10x8xf32> to vector<1x10x8xf32>
    %16 = vector.shape_cast %15 : vector<1x10x8xf32> to vector<1x10x8xf32>
    %17 = vector.broadcast %16 : vector<1x10x8xf32> to vector<8x10x8xf32>
    %cst_12 = arith.constant dense<0.000000e+00> : vector<8x10x128xf32>
    %18 = tpu.matmul %17, %14, %cst_12 {dimension_numbers = #tpu.dot_dimension_numbers<[2], [1], [1], [2], [0, 0, 0, 1, 1, 2], [0], [0]>} : vector<8x10x8xf32>, vector<8x8x128xf32>, vector<8x10x128xf32> -> vector<8x10x128xf32>
    %19 = vector.shape_cast %3 : vector<10x1xf32> to vector<1x10x1xf32>
    %20 = vector.broadcast %19 : vector<1x10x1xf32> to vector<8x10x128xf32>
    %21 = arith.addf %18, %20 : vector<8x10x128xf32>
    %cst_13 = arith.constant 0.000000e+00 : f32
    %22 = vector.broadcast %cst_13 : f32 to vector<8x10x128xf32>
    %23 = arith.maximumf %21, %22 : vector<8x10x128xf32>
    %24 = vector.shape_cast %4 : vector<1x10xf32> to vector<1x1x10xf32>
    %25 = vector.shape_cast %24 : vector<1x1x10xf32> to vector<1x1x10xf32>
    %26 = vector.broadcast %25 : vector<1x1x10xf32> to vector<8x1x10xf32>
    %cst_14 = arith.constant dense<0.000000e+00> : vector<8x1x128xf32>
    %27 = tpu.matmul %26, %23, %cst_14 {dimension_numbers = #tpu.dot_dimension_numbers<[2], [1], [1], [2], [0, 0, 0, 1, 1, 2], [0], [0]>} : vector<8x1x10xf32>, vector<8x10x128xf32>, vector<8x1x128xf32> -> vector<8x1x128xf32>
    %28 = vector.shape_cast %5 : vector<1x1xf32> to vector<1x1x1xf32>
    %29 = vector.broadcast %28 : vector<1x1x1xf32> to vector<8x1x128xf32>
    %30 = arith.addf %27, %29 : vector<8x1x128xf32>
    %cst_15 = arith.constant 0.000000e+00 : f32
    %31 = vector.broadcast %cst_15 : f32 to vector<8x1x128xf32>
    %32 = arith.maximumf %30, %31 : vector<8x1x128xf32>
    %cst_16 = arith.constant dense<0.000000e+00> : vector<8x1x128xf32>
    %33 = tpu.matmul %32, %6, %cst_16 {dimension_numbers = #tpu.dot_dimension_numbers<[2], [0], [0, 1], [1], [0, 0, 0, 1, 1, 1], [], []>} : vector<8x1x128xf32>, vector<128x128xf32>, vector<8x1x128xf32> -> vector<8x1x128xf32>
    %34 = vector.shape_cast %7 : vector<1x128xf32> to vector<1x1x128xf32>
    %35 = vector.broadcast %34 : vector<1x1x128xf32> to vector<8x1x128xf32>
    %36 = arith.addf %33, %35 : vector<8x1x128xf32>
    %c0_17 = arith.constant 0 : index
    %c0_18 = arith.constant 0 : index
    %c0_19 = arith.constant 0 : index
    %37 = vector.load %arg3[%c0_17, %c0_18, %c0_19] : memref<8x1x128xf32, #tpu.memory_space<vmem>>, vector<8x1x128xf32>
    tpu.vector_store %arg3[%c0_17, %c0_18, %c0_19], %36 {strides = array<i32>} : memref<8x1x128xf32, #tpu.memory_space<vmem>>, vector<8x1x128xf32>,
    return
  }
  func.func @transform_0(%arg0: i32) -> (i32, i32, i32) {
    %c0_i32 = arith.constant 0 : i32
    %c0_i32_0 = arith.constant 0 : i32
    %c0_i32_1 = arith.constant 0 : i32
    return %arg0, %c0_i32, %c0_i32_0 : i32, i32, i32
  }
  func.func @transform_1(%arg0: i32) -> (i32, i32) {
    %c0_i32 = arith.constant 0 : i32
    %c0_i32_0 = arith.constant 0 : i32
    %c0_i32_1 = arith.constant 0 : i32
    return %c0_i32, %c0_i32_0 : i32, i32
  }
  func.func @transform_2(%arg0: i32) -> (i32, i32, i32) {
    %c0_i32 = arith.constant 0 : i32
    %c0_i32_0 = arith.constant 0 : i32
    %c0_i32_1 = arith.constant 0 : i32
    return %arg0, %c0_i32, %c0_i32_0 : i32, i32, i32
  }
}

</mosaic_0001>

<bundles_post_ra>
// kernel: tpu_custom_call.1
= control target key start
LH: loop header
LB: loop body
LE: loop exit
PB: predicated region body
PF: predicated region fallthrough
CT: control target
= control target key end

     0   :  { %7 = vsyncpa [#allocation3], 0  ;;  %s2442_s0 = inlined_call_operand.hbm [shape: f32[8,8,16], index: 0, kind: input, shape index: {}]   ;;  %s2443_s1 = inlined_call_operand.hbm [shape: f32[184,128], index: 1, kind: input, shape index: {}]   ;;  %s2444_s2 = inlined_call_operand.hbm [shape: f32[1,8,128], index: 2, kind: output, shape index: {}]  }
   0x1   :  { %8 = vsyncpa [#allocation6], 0 }
   0x2   :  { %9 = vsyncpa [#allocation4], 0  ;;  %s2174_s9 = smov [#allocation2]   ;;  %s2102_s13 = scalar_lea.hbm %s2442_s0, 1024 }
   0x3   :  { %s15_s10 = sshll.u32 %s2174_s9, 4  ;;  %p2103_p0 = scmp.ne.s32.totalorder %s2442_s0, %s2102_s13  ;;  %s16_s10 = int_to_ptr.vmem [resolvable:$true] %s15_s10 }
   0x4   :  { %p2106_p1 = scmp.lt.u32.totalorder %s2102_s13, %s2442_s0 }
   0x6   :  { %p2108_p2 = pnand %p2106_p1, %p2103_p0 }
   0x8   :  { %2111 = shalt.err (!%p2108_p2)
}
   0x9   :  { %s2112_s18 = scalar_lea.vmem %s16_s10, 1024  ;;  %p2117_p4 = scmp.lt.s32.totalorder %s16_s10, %s16_s10 }
   0xa   :  { %p2113_p3 = scmp.ne.s32.totalorder %s16_s10, %s2112_s18  ;;  %p2118_p5 = scmp.lt.s32.totalorder %s2112_s18, %s2112_s18 }
   0xc   :  { %p2119_p6 = por %p2118_p5, %p2117_p4 }
   0xe   :  { %p2120_p7 = pnand %p2119_p6, %p2113_p3 }
  0x10   :  { %2123 = shalt.err (!%p2120_p7)
}
  0x11   :  { %s2175_s19 = smov 128   ;;  %s2176_s20 = smov 8  }
  0x12   :  { %21 = dma.hbm_to_vmem [thread:$0]  %s2442_s0, 1024, %s16_s10, [#allocation3], %s2175_s19, %s2175_s19, %s2176_s20  }
  0x13   :  { %s2177_s23 = smov [#allocation5]   ;;  %s2124_s27 = scalar_lea.hbm %s2443_s1, 2944 }
  0x14   :  { %s27_s24 = sshll.u32 %s2177_s23, 4  ;;  %p2125_p8 = scmp.ne.s32.totalorder %s2443_s1, %s2124_s27  ;;  %s28_s24 = int_to_ptr.vmem [resolvable:$true] %s27_s24 }
  0x15   :  { %p2128_p9 = scmp.lt.u32.totalorder %s2124_s27, %s2443_s1 }
  0x17   :  { %p2130_p10 = pnand %p2128_p9, %p2125_p8 }
  0x19   :  { %2133 = shalt.err (!%p2130_p10)
}
  0x1a   :  { %s2134_s4 = scalar_lea.vmem %s28_s24, 2944  ;;  %p2139_p12 = scmp.lt.s32.totalorder %s28_s24, %s28_s24 }
  0x1b   :  { %p2135_p11 = scmp.ne.s32.totalorder %s28_s24, %s2134_s4  ;;  %p2140_p13 = scmp.lt.s32.totalorder %s2134_s4, %s2134_s4 }
  0x1d   :  { %p2141_p0 = por %p2140_p13, %p2139_p12 }
  0x1f   :  { %p2142_p1 = pnand %p2141_p0, %p2135_p11 }
  0x21   :  { %2145 = shalt.err (!%p2142_p1)
}
  0x22   :  { %33 = dma.hbm_to_vmem [thread:$0]  %s2443_s1, 2944, %s28_s24, [#allocation6], %s2175_s19, %s2175_s19, %s2176_s20  }
  0x23   :  { %2168 = dma.done.wait [#allocation3], 1024  }
  0x24   :  { %2169 = vsyncadd [#allocation3], 4294966272 }
  0x25   :  { %2170 = dma.done.wait [#allocation6], 2944  }
  0x26   :  { %2171 = vsyncadd [#allocation6], 4294964352  ;;  %vm75_vm0 = vcmask 130048   ;;  %v40_v0 = vld [vmem:[#allocation5] sm:$0xff]  ;;  %v41_v1 = vld [vmem:[#allocation5 + $0x8] sm:$0xff]  ;;  %v2178_v11 = vmov 0.0   ;;  %v219_v12 = vlaneseq }
  0x27   :  { %v63_v2 = vld [vmem:[#allocation2] sm:$0xff]  ;;  %v2031_v3 = vpack.c.bf16 %v41_v1, %v40_v0  ;;  %v64_v4 = vld [vmem:[#allocation2 + $0x8] sm:$0xff]  ;;  %v65_v5 = vld [vmem:[#allocation2 + $0x10] sm:$0xff]  ;;  %927 = vmatprep.mubr.f32.mxu1 %v2178_v11  ;;  %v2179_v13 = vmov 8   ;;  %v2180_v14 = vmov 1966171168  }
  0x28   :  { %1984 = vmatprep.mubr.msk.f32.mxu0 %vm75_vm0, %v63_v2  ;;  %v66_v6 = vld [vmem:[#allocation2 + $0x18] sm:$0xff]  ;;  %v67_v7 = vld [vmem:[#allocation2 + $0x20] sm:$0xff]  ;;  %v68_v8 = vld [vmem:[#allocation2 + $0x28] sm:$0xff]  ;;  %2100 = vset.pattern.permute.xlu1 %v2179_v13  ;;  %v217_v15 = vunpack.c.l.s4 %v2180_v14  ;;  %v2239_v17 = vshrl.u32 %v219_v12, 7  ;;  %v2181_v49 = vmov 1983009808  }
  0x29   :  { %2032 = vmatprep.subr.bf16.mxu0 %v2031_v3  ;;  %v69_v9 = vld [vmem:[#allocation2 + $0x30] sm:$0xff]  ;;  %v70_v10 = vld [vmem:[#allocation2 + $0x38] sm:$0xff]  ;;  %2099 = vset.pattern.permute.xlu0 %v2179_v13  ;;  %v2246_v34 = vld [vmem:[#allocation5 + $0x20] sm:$0x3]  ;;  %v369_v50 = vunpack.c.l.s4 %v2181_v49  ;;  %v2182_v12 = vmov 1934713408  }
  0x2a   :  { %2034 = vmatpush3.bf16.msra.mxu0 %v2031_v3  ;;  %v2237_v16 = vld [vmem:[#allocation5 + $0x18] sm:$0xff]  ;;  %v218_v18 = vunpack.c.0.s8 %v217_v15  ;;  %v288_v22 = vsub.s32 0, %v2239_v17  ;;  %v1923_v52 = vld [vmem:[#allocation5 + $0x10] ss:$0 sm:$0xff]  ;;  %v433_v13 = vunpack.c.l.s4 %v2182_v12  ;;  %vm704_vm1 = vcmask 64512   ;;  %s2183_s1 = smov 118  }
  0x2b   :  { %v215_v19 = vcombine.high %v2237_v16, %v2237_v16  ;;  %v370_v55 = vunpack.c.0.s8 %v369_v50  ;;  %vm1473_vm2 = vcmask 1041408   ;;  %vm2184_vm3 = vmmov 1   ;;  %s2187_s7 = smov [#allocation7]  }
  0x2c   :  { %v221_v20 = vsub.s32 %v218_v18, %v2239_v17  ;;  %vm2376_vm4 = vmpackc.low %vm1473_vm2, %vm2184_vm3  ;;  %vm1470_vm5 = vcmask 80896   ;;  %vm2186_vm6 = vmmov 0   ;;  %s1913_s8 = sshll.u32 %s2187_s7, 4  ;;  %s1914_s8 = int_to_ptr.vmem [resolvable:$true] %s1913_s8 }
  0x2d   :  { %1985 = vmatmul.mubr.msk.f32.vlgmr.msra.gmra.mrb[0].mxu0 %vm75_vm0, %v64_v4  ;;  %v2250_v63 = vsub.s32 %v370_v55, %v2239_v17  ;;  %s2146_s9 = scalar_lea.vmem %s1914_s8, 128  ;;  %p2151_p3 = scmp.lt.s32.totalorder %s1914_s8, %s1914_s8 }
  0x2e   :  { %1987 = vmatprep.mubr.msk.f32.mxu0 %vm75_vm0, %v65_v5  ;;  %v222_v21 = vrot.slane %v2237_v16, %v221_v20  ;;  %v229_v23 = vrot.slane %v215_v19, %v221_v20  ;;  %v270_v37 = vrot.slane %v2246_v34, %v221_v20  ;;  %p2147_p2 = scmp.ne.s32.totalorder %s1914_s8, %s2146_s9  ;;  %p2152_p4 = scmp.lt.s32.totalorder %s2146_s9, %s2146_s9 }
  0x30   :  { %v238_v24 = vrot.slane %v222_v21, %v221_v20  ;;  %v230_v25 = vcombine.high %v222_v21, %v222_v21  ;;  %v231_v29 = vcombine.high %v229_v23, %v229_v23  ;;  %v245_v33 = vrot.slane %v229_v23, %v221_v20  ;;  %p2153_p5 = por %p2152_p4, %p2151_p3 }
  0x31   :  { %1988 = vmatmul.mubr.msk.f32.gmra.mrb[2].mxu0 %vm75_vm0, %v66_v6  ;;  %v271_v42 = vcombine.high %v270_v37, %v270_v37  ;;  %v278_v44 = vrot.slane %v270_v37, %v221_v20 }
  0x32   :  { %1990 = vmatprep.mubr.msk.f32.mxu0 %vm75_vm0, %v67_v7  ;;  %v289_v26 = vrot.slane %v238_v24, %v288_v22  ;;  %v260_v27 = vcombine.high %v238_v24, %v238_v24  ;;  %v252_v28 = vrot.slane %v230_v25, %v221_v20  ;;  %v259_v36 = vrot.slane %v231_v29, %v221_v20  ;;  %p2154_p6 = pnand %p2153_p5, %p2147_p2 }
  0x33   :  { %v305_v38 = vrot.slane %v245_v33, %v288_v22  ;;  %v261_v39 = vcombine.high %v245_v33, %v245_v33  ;;  %v285_v46 = vrot.slane %v271_v42, %v221_v20  ;;  %v321_v47 = vrot.slane %v278_v44, %v288_v22 }
  0x34   :  { %327 = vperm.xlu0 %2099, %v289_v26   ;;  %v297_v30 = vrot.slane %v260_v27, %v288_v22  ;;  %v293_v31 = vrot.slane %v252_v28, %v288_v22  ;;  %v262_v32 = vcombine.high %v252_v28, %v252_v28  ;;  %v309_v40 = vrot.slane %v259_v36, %v288_v22 }
  0x35   :  { %1991 = vmatmul.mubr.msk.f32.gmra.mrb[4].mxu0 %vm75_vm0, %v68_v8  ;;  %v263_v41 = vcombine.high %v259_v36, %v259_v36  ;;  %v313_v43 = vrot.slane %v261_v39, %v288_v22  ;;  %v325_v48 = vrot.slane %v285_v46, %v288_v22  ;;  %v434_v28 = vunpack.c.0.s8 %v433_v13 }
  0x36   :  { %1993 = vmatprep.mubr.msk.f32.mxu0 %vm75_vm0, %v69_v9  ;;  %335 = vperm.xlu1 %2100, %v297_v30   ;;  %v301_v35 = vrot.slane %v262_v32, %v288_v22 }
  0x37   :  { %v317_v45 = vrot.slane %v263_v41, %v288_v22  ;;  %v2259_v39 = vsub.s32 %v434_v28, %v2239_v17 }
  0x38   :  { %331 = vperm.xlu0 %2099, %v293_v31  }
  0x39   :  { %1994 = vmatmul.mubr.msk.f32.gmra.mrb[6].mxu0 %vm75_vm0, %v70_v10 }
  0x3a   :  { %773 = vmatprep.mubr.f32.mxu0 %v2178_v11  ;;  %339 = vperm.xlu1 %2100, %v301_v35  }
  0x3c   :  { %343 = vperm.xlu0 %2099, %v305_v38  }
  0x3e   :  { %347 = vperm.xlu1 %2100, %v309_v40  }
  0x40   :  { %351 = vperm.xlu0 %2099, %v313_v43  }
  0x42   :  { %355 = vperm.xlu1 %2100, %v317_v45  }
  0x44   :  { %359 = vperm.xlu0 %2099, %v321_v47  }
  0x46   :  { %363 = vperm.xlu1 %2100, %v325_v48  }
 0x100   :  { %v1986_v51 = vpop.f32.mrb[0].mxu0 }
 0x101   :  { %v166_v53 = vpop.f32.mrb[1].mxu0  ;;  %v172_v54 = vadd.f32 %v1986_v51, %v1923_v52 }
 0x102   :  { %v167_v56 = vadd.f32 %v1923_v52, %v166_v53 }
 0x103   :  { %v206_v61 = vmax.f32 %v172_v54, 0.0 }
 0x104   :  { %v1989_v57 = vpop.f32.mrb[2].mxu0  ;;  %v205_v0 = vmax.f32 %v167_v56, 0.0 }
 0x105   :  { %v182_v58 = vadd.f32 %v1989_v57, %v1923_v52  ;;  %v176_v59 = vpop.f32.mrb[3].mxu0 }
 0x106   :  { %v177_v60 = vadd.f32 %v1923_v52, %v176_v59 }
 0x107   :  { %v208_v62 = vmax.f32 %v182_v58, 0.0 }
 0x108   :  { %v207_v1 = vmax.f32 %v177_v60, 0.0  ;;  %v1992_v2 = vpop.f32.mrb[4].mxu0 }
 0x109   :  { %v382_v3 = vcombine.low %v206_v61, %v208_v62  ;;  %v383_v4 = vcombine.high %v206_v61, %v208_v62  ;;  %v186_v5 = vpop.f32.mrb[5].mxu0  ;;  %v192_v10 = vadd.f32 %v1992_v2, %v1923_v52  ;;  %v2295_v61 = vld [vmem:[#allocation5 + $0x28] sm:$0x1]  ;;  %v328_v62 = vpop.permute.xlu0 %327 }
 0x10a   :  { %v366_v6 = vcombine.low %v205_v0, %v207_v1  ;;  %v367_v7 = vcombine.high %v205_v0, %v207_v1  ;;  %v187_v18 = vadd.f32 %v1923_v52, %v186_v5  ;;  %1214 = vrot.lane.b32.xlu0 %v2295_v61, %s2183_s1  ;;  %v336_v0 = vpop.permute.xlu1 %335 }
 0x10b   :  { %v390_v8 = vrot.slane %v382_v3, %v2250_v63  ;;  %v397_v9 = vrot.slane %v383_v4, %v2250_v63  ;;  %v210_v26 = vmax.f32 %v192_v10, 0.0 }
 0x10c   :  { %v374_v14 = vrot.slane %v366_v6, %v2250_v63  ;;  %v381_v15 = vrot.slane %v367_v7, %v2250_v63  ;;  %v1995_v19 = vpop.f32.mrb[6].mxu0  ;;  %v209_v30 = vmax.f32 %v187_v18, 0.0  ;;  %v502_v6 = vcombine.low %v328_v62, %v336_v0 }
 0x10d   :  { %v202_v20 = vadd.f32 %v1995_v19, %v1923_v52  ;;  %v196_v21 = vpop.f32.mrb[7].mxu0  ;;  %v332_v1 = vpop.permute.xlu0 %331  ;;  %v503_v18 = vcombine.high %v328_v62, %v336_v0 }
 0x10e   :  { %v430_v22 = vcombine.low %v374_v14, %v390_v8  ;;  %v431_v23 = vcombine.high %v374_v14, %v390_v8  ;;  %v447_v24 = vcombine.high %v381_v15, %v397_v9  ;;  %v197_v25 = vadd.f32 %v1923_v52, %v196_v21  ;;  %v340_v2 = vpop.permute.xlu1 %339 }
 0x10f   :  { %v212_v27 = vmax.f32 %v202_v20, 0.0  ;;  %v446_v29 = vcombine.low %v381_v15, %v397_v9  ;;  %v518_v7 = vcombine.low %v332_v1, %v340_v2  ;;  %v519_v19 = vcombine.high %v332_v1, %v340_v2 }
 0x110   :  { %v211_v31 = vmax.f32 %v197_v25, 0.0  ;;  %v438_v46 = vrot.slane %v430_v22, %v2259_v39  ;;  %v445_v51 = vrot.slane %v431_v23, %v2259_v39  ;;  %v461_v52 = vrot.slane %v447_v24, %v2259_v39 }
 0x111   :  { %v414_v32 = vcombine.low %v210_v26, %v212_v27  ;;  %v415_v33 = vcombine.high %v210_v26, %v212_v27  ;;  %v454_v47 = vrot.slane %v446_v29, %v2259_v39  ;;  %v344_v3 = vpop.permute.xlu0 %343  ;;  %v526_v10 = vrot.slane %v518_v7, %v2250_v63 }
 0x112   :  { %v398_v35 = vcombine.low %v209_v30, %v211_v31  ;;  %v399_v36 = vcombine.high %v209_v30, %v211_v31  ;;  %v348_v4 = vpop.permute.xlu1 %347  ;;  %v517_v30 = vrot.slane %v503_v18, %v2250_v63  ;;  %v533_v31 = vrot.slane %v519_v19, %v2250_v63 }
 0x113   :  { %v422_v37 = vrot.slane %v414_v32, %v2250_v63  ;;  %v429_v38 = vrot.slane %v415_v33, %v2250_v63 }
 0x114   :  { %v406_v40 = vrot.slane %v398_v35, %v2250_v63  ;;  %v413_v41 = vrot.slane %v399_v36, %v2250_v63 }
 0x115   :  { %v352_v5 = vpop.permute.xlu0 %351 }
 0x116   :  { %v462_v42 = vcombine.low %v406_v40, %v422_v37  ;;  %v463_v43 = vcombine.high %v406_v40, %v422_v37  ;;  %v479_v44 = vcombine.high %v413_v41, %v429_v38  ;;  %v478_v45 = vcombine.low %v413_v41, %v429_v38 }
 0x117   :  { %v534_v8 = vcombine.low %v344_v3, %v352_v5  ;;  %v535_v20 = vcombine.high %v344_v3, %v352_v5 }
 0x118   :  { %v470_v48 = vrot.slane %v462_v42, %v2259_v39  ;;  %v486_v49 = vrot.slane %v478_v45, %v2259_v39  ;;  %v477_v50 = vrot.slane %v463_v43, %v2259_v39  ;;  %v493_v17 = vrot.slane %v479_v44, %v2259_v39 }
 0x119   :  { %v542_v12 = vrot.slane %v534_v8, %v2250_v63  ;;  %v360_v14 = vpop.permute.xlu0 %359  ;;  %v549_v32 = vrot.slane %v535_v20, %v2250_v63 }
 0x11a   :  { %v495_v53 = vcombine.high %v438_v46, %v470_v48  ;;  %v499_v54 = vcombine.high %v454_v47, %v486_v49  ;;  %v494_v55 = vcombine.low %v438_v46, %v470_v48  ;;  %v498_v56 = vcombine.low %v454_v47, %v486_v49 }
 0x11b   :  { %v497_v57 = vcombine.high %v445_v51, %v477_v50  ;;  %v496_v58 = vcombine.low %v445_v51, %v477_v50  ;;  %v501_v59 = vcombine.high %v461_v52, %v493_v17  ;;  %v500_v60 = vcombine.low %v461_v52, %v493_v17 }
 0x11c   :  { %709 = vmatprep.subr.mxu0 %v495_v53  ;;  %863 = vmatprep.subr.mxu1 %v499_v54  ;;  %v645_v24 = vrot.slane %v360_v14, %v2250_v63  ;;  %v638_v26 = vcombine.high %v360_v14, %v2178_v11  ;;  %v582_v48 = vcombine.low %v517_v30, %v533_v31 }
 0x11d   :  { %710 = vmatpush1.msra.mxu0 %v494_v55  ;;  %864 = vmatpush1.msra.mxu1 %v498_v56  ;;  %v583_v54 = vcombine.high %v517_v30, %v533_v31 }
 0x11e   :  { %1932 = vmatmul.mubr.msk.f32.vlgmr.msra.gmra.mrb[8].mxu0 %vm704_vm1, %v2237_v16  ;;  %786 = vmatprep.subr.mxu0 %v497_v57  ;;  %v652_v42 = vrot.slane %v638_v26, %v2250_v63  ;;  %v590_v2 = vrot.slane %v582_v48, %v2259_v39 }
 0x11f   :  { %787 = vmatpush1.msra.mxu0 %v496_v58  ;;  %779 = vmatprep.mubr.f32.mxu0 %v2178_v11 }
 0x120   :  { %940 = vmatprep.subr.mxu0 %v501_v59  ;;  %1936 = vmatmul.mubr.msk.f32.vlgmr.msra.gmra.mrb[0].mxu1 %vm704_vm1, %v2237_v16 }
 0x121   :  { %933 = vmatprep.mubr.f32.mxu1 %v2178_v11 }
 0x122   :  { %1933 = vmatmul.mubr.msk.f32.gmra.mrb[10].mxu0 %vm704_vm1, %v2246_v34 }
 0x123   :  { %850 = vmatprep.mubr.f32.mxu0 %v2178_v11 }
 0x124   :  { %1937 = vmatmul.mubr.msk.f32.gmra.mrb[2].mxu1 %vm704_vm1, %v2246_v34 }
 0x125   :  { %1562 = vmatprep.mubr.f32.mxu1 %v2178_v11 }
 0x126   :  { %1934 = vmatmul.mubr.msk.f32.vlgmr.msra.gmra.mrb[12].mxu0 %vm704_vm1, %v2237_v16 }
 0x127   :  { %941 = vmatpush1.msra.mxu0 %v500_v60  ;;  %856 = vmatprep.mubr.f32.mxu0 %v2178_v11 }
 0x12a   :  { %1935 = vmatmul.mubr.msk.f32.gmra.mrb[14].mxu0 %vm704_vm1, %v2246_v34 }
 0x12b   :  { %1004 = vmatprep.mubr.f32.mxu0 %v2178_v11 }
 0x12e   :  { %1938 = vmatmul.mubr.msk.f32.vlgmr.msra.gmra.mrb[16].mxu0 %vm704_vm1, %v2237_v16  ;;  %v356_v16 = vpop.permute.xlu1 %355 }
 0x12f   :  { %1010 = vmatprep.mubr.f32.mxu0 %v2178_v11  ;;  %v550_v9 = vcombine.low %v348_v4, %v356_v16  ;;  %v551_v21 = vcombine.high %v348_v4, %v356_v16 }
 0x131   :  { %v558_v13 = vrot.slane %v550_v9, %v2250_v63  ;;  %v565_v33 = vrot.slane %v551_v21, %v2250_v63 }
 0x132   :  { %1939 = vmatmul.mubr.msk.f32.gmra.mrb[18].mxu0 %vm704_vm1, %v2246_v34  ;;  %v510_v34 = vrot.slane %v502_v6, %v2250_v63  ;;  %v364_v15 = vpop.permute.xlu1 %363 }
 0x133   :  { %1633 = vmatprep.mubr.f32.mxu0 %v2178_v11  ;;  %v598_v23 = vcombine.low %v542_v12, %v558_v13  ;;  %v660_v25 = vrot.slane %v364_v15, %v2250_v63  ;;  %v653_v27 = vcombine.high %v364_v15, %v2178_v11  ;;  %v599_v29 = vcombine.high %v542_v12, %v558_v13 }
 0x134   :  { %v566_v22 = vcombine.low %v510_v34, %v526_v10  ;;  %v567_v28 = vcombine.high %v510_v34, %v526_v10  ;;  %v614_v49 = vcombine.low %v549_v32, %v565_v33  ;;  %v615_v58 = vcombine.high %v549_v32, %v565_v33 }
 0x135   :  { %v668_v36 = vcombine.low %v645_v24, %v660_v25  ;;  %v669_v37 = vcombine.high %v645_v24, %v660_v25  ;;  %v606_v40 = vrot.slane %v598_v23, %v2259_v39  ;;  %v667_v43 = vrot.slane %v653_v27, %v2250_v63 }
 0x136   :  { %v574_v38 = vrot.slane %v566_v22, %v2259_v39  ;;  %v581_v45 = vrot.slane %v567_v28, %v2259_v39  ;;  %v613_v46 = vrot.slane %v599_v29, %v2259_v39  ;;  %v622_v3 = vrot.slane %v614_v49, %v2259_v39 }
 0x137   :  { %v676_v51 = vrot.slane %v668_v36, %v2259_v39  ;;  %v683_v53 = vrot.slane %v669_v37, %v2259_v39  ;;  %v684_v56 = vcombine.low %v652_v42, %v667_v43  ;;  %v685_v62 = vcombine.high %v652_v42, %v667_v43 }
 0x138   :  { %v630_v17 = vcombine.low %v574_v38, %v606_v40  ;;  %v631_v55 = vcombine.high %v574_v38, %v606_v40  ;;  %v632_v59 = vcombine.low %v581_v45, %v613_v46  ;;  %v633_v1 = vcombine.high %v581_v45, %v613_v46 }
 0x139   :  { %v700_v5 = vcombine.high %v676_v51, %v2178_v11  ;;  %v701_v7 = vcombine.high %v683_v53, %v2178_v11  ;;  %v692_v34 = vrot.slane %v684_v56, %v2259_v39  ;;  %v597_v10 = vrot.slane %v583_v54, %v2259_v39 }
 0x13a   :  { %v629_v14 = vrot.slane %v615_v58, %v2259_v39  ;;  %v699_v15 = vrot.slane %v685_v62, %v2259_v39  ;;  %v634_v20 = vcombine.low %v590_v2, %v622_v3  ;;  %v635_v22 = vcombine.high %v590_v2, %v622_v3 }
 0x13b   :  { %v702_v31 = vcombine.high %v692_v34, %v2178_v11 }
 0x13c   :  { %v637_v36 = vcombine.high %v597_v10, %v629_v14  ;;  %v703_v56 = vcombine.high %v699_v15, %v2178_v11 }
 0x1f1   :  { %v775_v35 = vpop.f32.mrb[8].mxu0 }
 0x1f2   :  { %v777_v41 = vpop.f32.mrb[9].mxu0  ;;  %v776_v4 = vadd.f32 %v775_v35, %v630_v17  ;;  %v636_v35 = vcombine.low %v597_v10, %v629_v14 }
 0x1f3   :  { %v929_v44 = vpop.f32.mrb[0].mxu1  ;;  %v778_v8 = vadd.f32 %v777_v41, %v631_v55 }
 0x1f4   :  { %v931_v47 = vpop.f32.mrb[1].mxu1  ;;  %v930_v43 = vadd.f32 %v929_v44, %v634_v20 }
 0x1f5   :  { %v781_v50 = vpop.f32.mrb[10].mxu0 }
 0x1f6   :  { %v783_v52 = vpop.f32.mrb[11].mxu0  ;;  %v782_v23 = vadd.f32 %v781_v50, %v676_v51  ;;  %v932_v50 = vadd.f32 %v931_v47, %v635_v22 }
 0x1f7   :  { %v935_v57 = vpop.f32.mrb[2].mxu1  ;;  %v784_v32 = vadd.f32 %v783_v52, %v700_v5 }
 0x1f8   :  { %v937_v60 = vpop.f32.mrb[3].mxu1  ;;  %v936_v54 = vadd.f32 %v935_v57, %v692_v34 }
 0x1f9   :  { %v852_v0 = vpop.f32.mrb[12].mxu0 }
 0x1fa   :  { %v853_v16 = vadd.f32 %v852_v0, %v632_v59  ;;  %v854_v6 = vpop.f32.mrb[13].mxu0  ;;  %v938_v59 = vadd.f32 %v937_v60, %v702_v31 }
 0x1fb   :  { %v855_v9 = vadd.f32 %v854_v6, %v633_v1 }
 0x1fc   :  { %v1017_v12 = vcombine.low %v776_v4, %v853_v16  ;;  %v1018_v13 = vcombine.high %v776_v4, %v853_v16 }
 0x1fd   :  { %v1033_v18 = vcombine.low %v778_v8, %v855_v9  ;;  %v1034_v19 = vcombine.high %v778_v8, %v855_v9  ;;  %v858_v21 = vpop.f32.mrb[14].mxu0 }
 0x1fe   :  { %v1025_v24 = vrot.slane %v1017_v12, %v2250_v63  ;;  %v1032_v25 = vrot.slane %v1018_v13, %v2250_v63  ;;  %v859_v26 = vadd.f32 %v858_v21, %v683_v53  ;;  %v860_v27 = vpop.f32.mrb[15].mxu0 }
 0x1ff   :  { %v1041_v28 = vrot.slane %v1033_v18, %v2250_v63  ;;  %v1048_v29 = vrot.slane %v1034_v19, %v2250_v63  ;;  %v861_v30 = vadd.f32 %v860_v27, %v701_v7 }
 0x200   :  { %v1153_v33 = vcombine.low %v782_v23, %v859_v26 }
 0x201   :  { %v1081_v37 = vcombine.low %v1025_v24, %v1041_v28  ;;  %v1082_v38 = vcombine.high %v1025_v24, %v1041_v28  ;;  %v1097_v40 = vcombine.low %v1032_v25, %v1048_v29  ;;  %v1098_v41 = vcombine.high %v1032_v25, %v1048_v29  ;;  %v1006_v42 = vpop.f32.mrb[16].mxu0 }
 0x202   :  { %v1160_v45 = vrot.slane %v1153_v33, %v2250_v63  ;;  %v1161_v46 = vcombine.low %v784_v32, %v861_v30  ;;  %v1007_v48 = vadd.f32 %v1006_v42, %v636_v35  ;;  %v1008_v49 = vpop.f32.mrb[17].mxu0 }
 0x203   :  { %v1009_v52 = vadd.f32 %v1008_v49, %v637_v36  ;;  %v1089_v6 = vrot.slane %v1081_v37, %v2259_v39  ;;  %v1096_v7 = vrot.slane %v1082_v38, %v2259_v39  ;;  %v1105_v13 = vrot.slane %v1097_v40, %v2259_v39 }
 0x204   :  { %v1168_v17 = vrot.slane %v1161_v46, %v2250_v63  ;;  %v1049_v51 = vcombine.low %v930_v43, %v1007_v48  ;;  %v1050_v53 = vcombine.high %v930_v43, %v1007_v48  ;;  %v1112_v14 = vrot.slane %v1098_v41, %v2259_v39 }
 0x205   :  { %v1012_v55 = vpop.f32.mrb[18].mxu0  ;;  %v1065_v44 = vcombine.low %v932_v50, %v1009_v52  ;;  %v1066_v2 = vcombine.high %v932_v50, %v1009_v52 }
 0x206   :  { %v1185_v58 = vcombine.low %v1160_v45, %v1168_v17  ;;  %v1057_v62 = vrot.slane %v1049_v51, %v2250_v63  ;;  %v1014_v0 = vpop.f32.mrb[19].mxu0  ;;  %v1064_v1 = vrot.slane %v1050_v53, %v2250_v63  ;;  %v1013_v3 = vadd.f32 %v1012_v55, %v699_v15 }
 0x207   :  { %v1015_v47 = vadd.f32 %v1014_v0, %v703_v56  ;;  %v1073_v4 = vrot.slane %v1065_v44, %v2250_v63  ;;  %v1080_v5 = vrot.slane %v1066_v2, %v2250_v63 }
 0x208   :  { %v1169_v16 = vcombine.low %v936_v54, %v1013_v3  ;;  %v1192_v19 = vrot.slane %v1185_v58, %v2259_v39 }
 0x209   :  { %v1177_v57 = vcombine.low %v938_v59, %v1015_v47  ;;  %v1113_v60 = vcombine.low %v1057_v62, %v1073_v4  ;;  %v1114_v8 = vcombine.high %v1057_v62, %v1073_v4  ;;  %v1129_v9 = vcombine.low %v1064_v1, %v1080_v5 }
 0x20a   :  { %v1130_v34 = vcombine.high %v1064_v1, %v1080_v5  ;;  %v1176_v10 = vrot.slane %v1169_v16, %v2250_v63 }
 0x20b   :  { %v1184_v12 = vrot.slane %v1177_v57, %v2250_v63  ;;  %v1121_v15 = vrot.slane %v1113_v60, %v2259_v39  ;;  %v1128_v18 = vrot.slane %v1114_v8, %v2259_v39  ;;  %v1137_v20 = vrot.slane %v1129_v9, %v2259_v39 }
 0x20c   :  { %v1144_v21 = vrot.slane %v1130_v34, %v2259_v39 }
 0x20d   :  { %v1193_v22 = vcombine.low %v1176_v10, %v1184_v12  ;;  %v1145_v23 = vcombine.low %v1089_v6, %v1121_v15  ;;  %v1146_v24 = vcombine.high %v1089_v6, %v1121_v15  ;;  %v1147_v25 = vcombine.low %v1096_v7, %v1128_v18 }
 0x20e   :  { %v1148_v26 = vcombine.high %v1096_v7, %v1128_v18  ;;  %v1149_v27 = vcombine.low %v1105_v13, %v1137_v20  ;;  %v1150_v28 = vcombine.high %v1105_v13, %v1137_v20  ;;  %v1151_v29 = vcombine.low %v1112_v14, %v1144_v21 }
 0x20f   :  { %v1152_v30 = vcombine.high %v1112_v14, %v1144_v21  ;;  %v1203_v31 = vmax.f32 %v1145_v23, 0.0  ;;  %v1204_v32 = vmax.f32 %v1146_v24, 0.0  ;;  %v1205_v33 = vmax.f32 %v1147_v25, 0.0 }
 0x210   :  { %v1206_v35 = vmax.f32 %v1148_v26, 0.0  ;;  %v1207_v36 = vmax.f32 %v1149_v27, 0.0  ;;  %v1208_v37 = vmax.f32 %v1150_v28, 0.0  ;;  %v1209_v38 = vmax.f32 %v1151_v29, 0.0 }
 0x211   :  { %v1210_v40 = vmax.f32 %v1152_v30, 0.0  ;;  %v1219_v41 = vcombine.low %v1203_v31, %v1205_v33  ;;  %v1220_v42 = vcombine.high %v1203_v31, %v1205_v33  ;;  %v1200_v59 = vrot.slane %v1193_v22, %v2259_v39 }
 0x212   :  { %v1235_v43 = vcombine.low %v1204_v32, %v1206_v35  ;;  %v1236_v45 = vcombine.high %v1204_v32, %v1206_v35  ;;  %v1251_v46 = vcombine.low %v1207_v36, %v1209_v38  ;;  %v1252_v48 = vcombine.high %v1207_v36, %v1209_v38 }
 0x213   :  { %v1267_v49 = vcombine.low %v1208_v37, %v1210_v40  ;;  %v1268_v50 = vcombine.high %v1208_v37, %v1210_v40  ;;  %v1227_v17 = vrot.slane %v1219_v41, %v2250_v63  ;;  %v1234_v51 = vrot.slane %v1220_v42, %v2250_v63  ;;  %v1215_v37 = vpop.permute.xlu0 %1214 }
 0x214   :  { %v1243_v53 = vrot.slane %v1235_v43, %v2250_v63  ;;  %v1250_v52 = vrot.slane %v1236_v45, %v2250_v63  ;;  %v1259_v54 = vrot.slane %v1251_v46, %v2250_v63  ;;  %v1266_v55 = vrot.slane %v1252_v48, %v2250_v63  ;;  %2083 = vpush %v1215_v37 }
 0x215   :  { %v1275_v56 = vrot.slane %v1267_v49, %v2250_v63  ;;  %v1282_v58 = vrot.slane %v1268_v50, %v2250_v63  ;;  %v1201_v4 = vcombine.low %v1192_v19, %v1200_v59  ;;  %v1202_v5 = vcombine.high %v1192_v19, %v1200_v59  ;;  %v48_v59 = vld [vmem:[#allocation5 + $0x40] sm:$0xff] }
 0x216   :  { %v1283_v62 = vcombine.low %v1227_v17, %v1243_v53  ;;  %v1284_v44 = vcombine.high %v1227_v17, %v1243_v53  ;;  %v1299_v0 = vcombine.low %v1234_v51, %v1250_v52  ;;  %v1300_v47 = vcombine.high %v1234_v51, %v1250_v52 }
 0x217   :  { %v1315_v1 = vcombine.low %v1259_v54, %v1275_v56  ;;  %v1316_v2 = vcombine.high %v1259_v54, %v1275_v56  ;;  %v1331_v3 = vcombine.low %v1266_v55, %v1282_v58  ;;  %v1211_v9 = vmax.f32 %v1201_v4, 0.0  ;;  %v47_v56 = vld [vmem:[#allocation5 + $0x38] sm:$0xff]  ;;  %v53_v4 = vld [vmem:[#allocation5 + $0x68] sm:$0xff] }
 0x218   :  { %v1291_v16 = vrot.slane %v1283_v62, %v2259_v39  ;;  %v1298_v57 = vrot.slane %v1284_v44, %v2259_v39  ;;  %v1307_v60 = vrot.slane %v1299_v0, %v2259_v39  ;;  %v1212_v34 = vmax.f32 %v1202_v5, 0.0  ;;  %v49_v62 = vld [vmem:[#allocation5 + $0x48] sm:$0xff] }
 0x219   :  { %v1323_v6 = vrot.slane %v1315_v1, %v2259_v39  ;;  %v1330_v7 = vrot.slane %v1316_v2, %v2259_v39  ;;  %v1339_v8 = vrot.slane %v1331_v3, %v2259_v39  ;;  %v1314_v10 = vrot.slane %v1300_v47, %v2259_v39  ;;  %v50_v1 = vld [vmem:[#allocation5 + $0x50] sm:$0xff]  ;;  %v51_v2 = vld [vmem:[#allocation5 + $0x58] sm:$0xff]  ;;  %v52_v47 = vld [vmem:[#allocation5 + $0x60] sm:$0xff] }
 0x21a   :  { %v1332_v12 = vcombine.high %v1266_v55, %v1282_v58  ;;  %v1355_v19 = vcombine.high %v1211_v9, %v2178_v11  ;;  %v1362_v20 = vrot.slane %v1211_v9, %v2250_v63  ;;  %v1370_v21 = vcombine.high %v1212_v34, %v2178_v11  ;;  %v46_v55 = vld [vmem:[#allocation5 + $0x30] sm:$0xff]  ;;  %v59_v9 = vld [vmem:[#allocation5 + $0x98] sm:$0xff] }
 0x21b   :  { %v1347_v13 = vcombine.low %v1291_v16, %v1323_v6  ;;  %v1348_v14 = vcombine.high %v1291_v16, %v1323_v6  ;;  %v1349_v15 = vcombine.low %v1298_v57, %v1330_v7  ;;  %v1350_v18 = vcombine.high %v1298_v57, %v1330_v7  ;;  %v54_v16 = vld [vmem:[#allocation5 + $0x70] sm:$0xff]  ;;  %v55_v57 = vld [vmem:[#allocation5 + $0x78] sm:$0xff]  ;;  %v57_v7 = vld [vmem:[#allocation5 + $0x88] sm:$0xff] }
 0x21c   :  { %v1377_v22 = vrot.slane %v1212_v34, %v2250_v63  ;;  %v1351_v23 = vcombine.low %v1307_v60, %v1339_v8  ;;  %v1352_v24 = vcombine.high %v1307_v60, %v1339_v8  ;;  %v1346_v25 = vrot.slane %v1332_v12, %v2259_v39  ;;  %v58_v8 = vld [vmem:[#allocation5 + $0x90] sm:$0xff]  ;;  %v61_v12 = vld [vmem:[#allocation5 + $0xa8] sm:$0xff] }
 0x21d   :  { %v1369_v26 = vrot.slane %v1355_v19, %v2250_v63  ;;  %v1384_v27 = vrot.slane %v1370_v21, %v2250_v63  ;;  %v2060_v58 = vpack.c.bf16 %v47_v56, %v46_v55  ;;  %v2185_v44 = vmov 0.0|0.0  }
 0x21e   :  { %v1385_v28 = vcombine.low %v1362_v20, %v1377_v22  ;;  %v1386_v29 = vcombine.high %v1362_v20, %v1377_v22  ;;  %v1353_v30 = vcombine.low %v1314_v10, %v1346_v25  ;;  %v1354_v31 = vcombine.high %v1314_v10, %v1346_v25  ;;  %v60_v10 = vld [vmem:[#allocation5 + $0xa0] sm:$0xff] }
 0x21f   :  { %v1401_v35 = vcombine.low %v1369_v26, %v1384_v27  ;;  %v1402_v36 = vcombine.high %v1369_v26, %v1384_v27  ;;  %v2063_v0 = vpack.c.bf16 %v49_v62, %v48_v59  ;;  %v2066_v3 = vpack.c.bf16 %v51_v2, %v50_v1  ;;  %v1952_v1 = vld [vmem:[#allocation5 + $0xb0] ss:$0 sm:$0xff] }
 0x220   :  { %v1393_v32 = vrot.slane %v1385_v28, %v2259_v39  ;;  %v1400_v33 = vrot.slane %v1386_v29, %v2259_v39  ;;  %v2069_v5 = vpack.c.bf16 %v53_v4, %v52_v47  ;;  %v2072_v6 = vpack.c.bf16 %v55_v57, %v54_v16 }
 0x221   :  { %v1409_v45 = vrot.slane %v1401_v35, %v2259_v39  ;;  %v1416_v46 = vrot.slane %v1402_v36, %v2259_v39  ;;  %v2078_v34 = vpack.c.bf16 %v59_v9, %v58_v8 }
 0x222   :  { %v1417_v38 = vcombine.high %v1393_v32, %v2178_v11  ;;  %v1418_v40 = vcombine.high %v1400_v33, %v2178_v11  ;;  %v2038_v41 = vpack.c.bf16 %v1393_v32, %v1347_v13  ;;  %v2044_v42 = vpack.c.bf16 %v1400_v33, %v1349_v15 }
 0x223   :  { %v1419_v50 = vcombine.high %v1409_v45, %v2178_v11  ;;  %v1420_v17 = vcombine.high %v1416_v46, %v2178_v11  ;;  %v2050_v51 = vpack.c.bf16 %v1409_v45, %v1351_v23  ;;  %v2056_v53 = vpack.c.bf16 %v1416_v46, %v1353_v30 }
 0x224   :  { %v2035_v48 = vpack.c.bf16 %v1417_v38, %v1348_v14  ;;  %v2041_v49 = vpack.c.bf16 %v1418_v40, %v1350_v18  ;;  %v2081_v13 = vpack.c.bf16 %v61_v12, %v60_v10 }
 0x225   :  { %v2047_v52 = vpack.c.bf16 %v1419_v50, %v1352_v24  ;;  %v2053_v54 = vpack.c.bf16 %v1420_v17, %v1354_v31 }
 0x226   :  { %2037 = vmatprep.subr.msk.bf16.mxu1 %vm2376_vm4, %v2035_v48  ;;  %2043 = vmatprep.subr.msk.bf16.mxu0 %vm2376_vm4, %v2041_v49 }
 0x227   :  { %2040 = vmatpush1.bf16.msk.msra.mxu1 %vm2376_vm4, %v2038_v41  ;;  %2046 = vmatpush1.bf16.msk.msra.mxu0 %vm2376_vm4, %v2044_v42 }
 0x228   :  { %2049 = vmatprep.subr.msk.bf16.mxu1 %vm2376_vm4, %v2047_v52  ;;  %2055 = vmatprep.subr.msk.bf16.mxu0 %vm2376_vm4, %v2053_v54 }
 0x22a   :  { %1942 = vmatmul.mubr.msk.f32.vlgmr.msra.gmra.mrb[4].mxu1 %vm1470_vm5, %v2295_v61  ;;  %1945 = vmatmul.mubr.msk.f32.vlgmr.msra.gmra.mrb[20].mxu0 %vm1470_vm5, %v2295_v61 }
 0x22b   :  { %2052 = vmatpush1.bf16.msk.msra.mxu1 %vm2376_vm4, %v2050_v51  ;;  %2058 = vmatpush1.bf16.msk.msra.mxu0 %vm2376_vm4, %v2056_v53 }
 0x22c   :  { %1704 = vmatprep.mubr.f32.mxu1 %v2178_v11  ;;  %1775 = vmatprep.mubr.f32.mxu0 %v2178_v11 }
 0x22d   :  { %2059 = vmatprep.subr.bf16.mxu1 %v2185_v44 }
 0x22e   :  { %1948 = vmatmul.mubr.msk.f32.vlgmr.msra.gmra.mrb[6].mxu1 %vm1470_vm5, %v2295_v61  ;;  %1951 = vmatmul.mubr.msk.f32.vlgmr.msra.gmra.mrb[22].mxu0 %vm1470_vm5, %v2295_v61  ;;  %v56_v61 = vld [vmem:[#allocation5 + $0x80] sm:$0xff] }
 0x22f   :  { %2061 = vmatpush3.bf16.msra.mxu1 %v2060_v58  ;;  %v2075_v60 = vpack.c.bf16 %v57_v7, %v56_v61  ;;  %2028 = vmatprep.mubr.msk.f32.mxu1 %vm2186_vm6, %v2178_v11 }
 0x230   :  { %2062 = vmatprep.subr.bf16.mxu1 %v2185_v44 }
 0x233   :  { %2064 = vmatpush3.bf16.msra.mxu1 %v2063_v0 }
 0x234   :  { %2065 = vmatprep.subr.bf16.mxu1 %v2185_v44 }
 0x237   :  { %2067 = vmatpush3.bf16.msra.mxu1 %v2066_v3 }
 0x238   :  { %2068 = vmatprep.subr.bf16.mxu1 %v2185_v44 }
 0x23b   :  { %2070 = vmatpush3.bf16.msra.mxu1 %v2069_v5 }
 0x23c   :  { %2071 = vmatprep.subr.bf16.mxu1 %v2185_v44 }
 0x23f   :  { %2073 = vmatpush3.bf16.msra.mxu1 %v2072_v6 }
 0x240   :  { %2074 = vmatprep.subr.bf16.mxu1 %v2185_v44 }
 0x243   :  { %2076 = vmatpush3.bf16.msra.mxu1 %v2075_v60 }
 0x244   :  { %2077 = vmatprep.subr.bf16.mxu1 %v2185_v44 }
 0x245   :  { %s2084_s6 = spop %2083 }
 0x246   :  { %v1217_v14 = vstv %s2084_s6 }
 0x247   :  { %2079 = vmatpush3.bf16.msra.mxu1 %v2078_v34  ;;  %v1421_v15 = vcombine.high %v1217_v14, %v2178_v11  ;;  %v1428_v18 = vrot.slane %v1217_v14, %v2250_v63 }
 0x248   :  { %2080 = vmatprep.subr.bf16.mxu1 %v2185_v44 }
 0x249   :  { %v1435_v19 = vrot.slane %v1421_v15, %v2250_v63  ;;  %v1436_v20 = vcombine.high %v1428_v18, %v2178_v11  ;;  %v1443_v21 = vrot.slane %v1428_v18, %v2259_v39 }
 0x24b   :  { %2082 = vmatpush3.bf16.msra.mxu1 %v2081_v13  ;;  %v1450_v22 = vrot.slane %v1436_v20, %v2259_v39  ;;  %v1451_v23 = vcombine.high %v1435_v19, %v2178_v11  ;;  %v1466_v24 = vcombine.high %v1443_v21, %v2178_v11  ;;  %v1458_v29 = vrot.slane %v1435_v19, %v2259_v39 }
 0x24d   :  { %v1467_v25 = vcombine.high %v1450_v22, %v2178_v11  ;;  %v1465_v26 = vrot.slane %v1451_v23, %v2259_v39  ;;  %v1468_v43 = vcombine.high %v1458_v29, %v2178_v11 }
 0x24f   :  { %v1469_v37 = vcombine.high %v1465_v26, %v2178_v11 }
 0x2fd   :  { %v1564_v27 = vpop.f32.mrb[4].mxu1  ;;  %v1635_v28 = vpop.f32.mrb[20].mxu0 }
 0x2fe   :  { %v1565_v30 = vadd.f32 %v1564_v27, %v1443_v21  ;;  %v1636_v31 = vadd.f32 %v1635_v28, %v1450_v22  ;;  %v1566_v32 = vpop.f32.mrb[5].mxu1  ;;  %v1637_v33 = vpop.f32.mrb[21].mxu0 }
 0x2ff   :  { %v1567_v35 = vadd.f32 %v1566_v32, %v1466_v24  ;;  %v1638_v36 = vadd.f32 %v1637_v33, %v1467_v25 }
 0x300   :  { %v1782_v38 = vcombine.low %v1565_v30, %v1636_v31 }
 0x301   :  { %v1790_v40 = vcombine.low %v1567_v35, %v1638_v36  ;;  %v1706_v41 = vpop.f32.mrb[6].mxu1  ;;  %v1777_v42 = vpop.f32.mrb[22].mxu0 }
 0x302   :  { %v1789_v45 = vrot.slane %v1782_v38, %v2250_v63  ;;  %v1707_v46 = vadd.f32 %v1706_v41, %v1458_v29  ;;  %v1778_v48 = vadd.f32 %v1777_v42, %v1465_v26  ;;  %v1708_v49 = vpop.f32.mrb[7].mxu1  ;;  %v1779_v50 = vpop.f32.mrb[23].mxu0 }
 0x303   :  { %v1797_v17 = vrot.slane %v1790_v40, %v2250_v63  ;;  %v1709_v51 = vadd.f32 %v1708_v49, %v1468_v43  ;;  %v1780_v53 = vadd.f32 %v1779_v50, %v1469_v37 }
 0x304   :  { %v1798_v52 = vcombine.low %v1707_v46, %v1778_v48 }
 0x305   :  { %v1814_v54 = vcombine.low %v1789_v45, %v1797_v17  ;;  %v1806_v55 = vcombine.low %v1709_v51, %v1780_v53 }
 0x306   :  { %v1805_v56 = vrot.slane %v1798_v52, %v2250_v63 }
 0x307   :  { %v1813_v58 = vrot.slane %v1806_v55, %v2250_v63  ;;  %v1821_v11 = vrot.slane %v1814_v54, %v2259_v39 }
 0x309   :  { %v1822_v59 = vcombine.low %v1805_v56, %v1813_v58 }
 0x30b   :  { %v1829_v62 = vrot.slane %v1822_v59, %v2259_v39 }
 0x30d   :  { %v1830_v44 = vcombine.low %v1821_v11, %v1829_v62 }
 0x30f   :  { %v1831_v0 = vmax.f32 %v1830_v44, 0.0 }
 0x311   :  { %2029 = vmatmul.mubr.f32.vlgmr.msra.gmra.mrb[8].mxu1 %v1831_v0 }
 0x3e4   :  { %v1902_v2 = vpop.f32.mrb[8].mxu1 }
 0x3e5   :  { %v1903_v3 = vadd.f32 %v1952_v1, %v1902_v2  ;;  %v2030_v47 = vpop.f32.mrb[9].mxu1 }
 0x3e7   :  { %1906 = vst [vmem:[#allocation7] sm:$0xff] %v1903_v3 }
 0x3e8   :  { %2157 = shalt.err (!%p2154_p6)
}
 0x3e9   :  { %s2158_s12 = scalar_lea.hbm %s2444_s2, 128 }
 0x3ea   :  { %p2159_p7 = scmp.ne.s32.totalorder %s2444_s2, %s2158_s12  ;;  %p2162_p8 = scmp.lt.u32.totalorder %s2158_s12, %s2444_s2 }
 0x3ec   :  { %p2164_p9 = pnand %p2162_p8, %p2159_p7 }
 0x3ee   :  { %2167 = shalt.err (!%p2164_p9)
}
 0x3ef   :  { %1916 = dma.vmem_to_hbm [thread:$0]  %s1914_s8, 128, %s2444_s2, [#allocation4]  }
 0x3f0   :  { %2172 = dma.done.wait [#allocation4], 128  }
 0x3f1   :  { %2173 = vsyncadd [#allocation4], 4294967168 }
 0x3f2   :  { %1920 = vsyncpa [#allocation3], 1 }
 0x3f3   :  { %1921 = vsyncpa [#allocation6], 1 }
 0x3f4   :  { %1922 = vsyncpa [#allocation4], 1 }

// kernel: tpu_custom_call.1
= control target key start
LH: loop header
LB: loop body
LE: loop exit
PB: predicated region body
PF: predicated region fallthrough
CT: control target
= control target key end

     0   :  { %7 = vsyncpa [#allocation3], 0  ;;  %s2257_s0 = inlined_call_operand.hbm [shape: f32[8,8,16], index: 0, kind: input, shape index: {}]   ;;  %s2258_s1 = inlined_call_operand.hbm [shape: f32[184,128], index: 1, kind: input, shape index: {}]   ;;  %s2259_s2 = inlined_call_operand.hbm [shape: f32[8,1,128], index: 2, kind: output, shape index: {}]  }
   0x1   :  { %8 = vsyncpa [#allocation6], 0 }
   0x2   :  { %9 = vsyncpa [#allocation4], 0  ;;  %s2061_s9 = smov [#allocation2]   ;;  %s1989_s13 = scalar_lea.hbm %s2257_s0, 1024 }
   0x3   :  { %s15_s10 = sshll.u32 %s2061_s9, 4  ;;  %p1990_p0 = scmp.ne.s32.totalorder %s2257_s0, %s1989_s13  ;;  %s16_s10 = int_to_ptr.vmem [resolvable:$true] %s15_s10 }
   0x4   :  { %p1993_p1 = scmp.lt.u32.totalorder %s1989_s13, %s2257_s0 }
   0x6   :  { %p1995_p2 = pnand %p1993_p1, %p1990_p0 }
   0x8   :  { %1998 = shalt.err (!%p1995_p2)
}
   0x9   :  { %s1999_s18 = scalar_lea.vmem %s16_s10, 1024  ;;  %p2004_p4 = scmp.lt.s32.totalorder %s16_s10, %s16_s10 }
   0xa   :  { %p2000_p3 = scmp.ne.s32.totalorder %s16_s10, %s1999_s18  ;;  %p2005_p5 = scmp.lt.s32.totalorder %s1999_s18, %s1999_s18 }
   0xc   :  { %p2006_p6 = por %p2005_p5, %p2004_p4 }
   0xe   :  { %p2007_p7 = pnand %p2006_p6, %p2000_p3 }
  0x10   :  { %2010 = shalt.err (!%p2007_p7)
}
  0x11   :  { %s2062_s19 = smov 128   ;;  %s2063_s20 = smov 8  }
  0x12   :  { %21 = dma.hbm_to_vmem [thread:$0]  %s2257_s0, 1024, %s16_s10, [#allocation3], %s2062_s19, %s2062_s19, %s2063_s20  }
  0x13   :  { %s2064_s23 = smov [#allocation5]   ;;  %s2011_s27 = scalar_lea.hbm %s2258_s1, 2944 }
  0x14   :  { %s27_s24 = sshll.u32 %s2064_s23, 4  ;;  %p2012_p8 = scmp.ne.s32.totalorder %s2258_s1, %s2011_s27  ;;  %s28_s24 = int_to_ptr.vmem [resolvable:$true] %s27_s24 }
  0x15   :  { %p2015_p9 = scmp.lt.u32.totalorder %s2011_s27, %s2258_s1 }
  0x17   :  { %p2017_p10 = pnand %p2015_p9, %p2012_p8 }
  0x19   :  { %2020 = shalt.err (!%p2017_p10)
}
  0x1a   :  { %s2021_s4 = scalar_lea.vmem %s28_s24, 2944  ;;  %p2026_p12 = scmp.lt.s32.totalorder %s28_s24, %s28_s24 }
  0x1b   :  { %p2022_p11 = scmp.ne.s32.totalorder %s28_s24, %s2021_s4  ;;  %p2027_p13 = scmp.lt.s32.totalorder %s2021_s4, %s2021_s4 }
  0x1d   :  { %p2028_p0 = por %p2027_p13, %p2026_p12 }
  0x1f   :  { %p2029_p1 = pnand %p2028_p0, %p2022_p11 }
  0x21   :  { %2032 = shalt.err (!%p2029_p1)
}
  0x22   :  { %33 = dma.hbm_to_vmem [thread:$0]  %s2258_s1, 2944, %s28_s24, [#allocation6], %s2062_s19, %s2062_s19, %s2063_s20  }
  0x23   :  { %2055 = dma.done.wait [#allocation3], 1024  }
  0x24   :  { %2056 = vsyncadd [#allocation3], 4294966272 }
  0x25   :  { %2057 = dma.done.wait [#allocation6], 2944  }
  0x26   :  { %2058 = vsyncadd [#allocation6], 4294964352  ;;  %vm75_vm0 = vcmask 130048   ;;  %v40_v0 = vld [vmem:[#allocation5] sm:$0xff]  ;;  %v41_v1 = vld [vmem:[#allocation5 + $0x8] sm:$0xff]  ;;  %vm223_vm1 = vcmask 64512  }
  0x27   :  { %v63_v2 = vld [vmem:[#allocation2] sm:$0xff]  ;;  %v1912_v3 = vpack.c.bf16 %v41_v1, %v40_v0  ;;  %v64_v4 = vld [vmem:[#allocation2 + $0x8] sm:$0xff]  ;;  %v65_v5 = vld [vmem:[#allocation2 + $0x10] sm:$0xff]  ;;  %v2065_v12 = vmov 8   ;;  %v2066_v39 = vmov 0.0|0.0   ;;  %vm2067_vm2 = vmmov 0  }
  0x28   :  { %1769 = vmatprep.mubr.msk.f32.mxu0 %vm75_vm0, %v63_v2  ;;  %v66_v6 = vld [vmem:[#allocation2 + $0x18] sm:$0xff]  ;;  %v67_v7 = vld [vmem:[#allocation2 + $0x20] sm:$0xff]  ;;  %v68_v8 = vld [vmem:[#allocation2 + $0x28] sm:$0xff]  ;;  %1986 = vset.pattern.permute.xlu0 %v2065_v12  ;;  %v2068_v40 = vmov 0.0   ;;  %v2069_v42 = vmov 10   ;;  %vm852_vm3 = vcmask 1041408  }
  0x29   :  { %1913 = vmatprep.subr.bf16.mxu0 %v1912_v3  ;;  %v69_v9 = vld [vmem:[#allocation2 + $0x30] sm:$0xff]  ;;  %v70_v10 = vld [vmem:[#allocation2 + $0x38] sm:$0xff]  ;;  %v44_v13 = vld [vmem:[#allocation5 + $0x20] sm:$0x3]  ;;  %1987 = vset.pattern.permute.xlu1 %v2069_v42  ;;  %vm2070_vm4 = vmmov 1   ;;  %vm849_vm6 = vcmask 80896  }
  0x2a   :  { %1915 = vmatpush3.bf16.msra.mxu0 %v1912_v3  ;;  %v43_v11 = vld [vmem:[#allocation5 + $0x18] sm:$0xff]  ;;  %v1645_v14 = vld [vmem:[#allocation5 + $0x10] ss:$0 sm:$0xff]  ;;  %v2144_v41 = vld [vmem:[#allocation5 + $0x28] sm:$0x1]  ;;  %vm1454_vm7 = vcmask 1041409  }
  0x2b   :  { %1803 = vmatprep.mubr.msk.f32.mxu1 %vm223_vm1, %v43_v11  ;;  %215 = vperm.xlu0 %1986, %v43_v11   ;;  %vm2154_vm5 = vmpackc.low %vm852_vm3, %vm2070_vm4  ;;  %vm1457_vm8 = vcmask 1042434   ;;  %vm1460_vm9 = vcmask 1043459   ;;  %vm1463_vm10 = vcmask 1044484   ;;  %vm1466_vm11 = vcmask 1045509   ;;  %s2072_s1 = smov [#allocation7]  }
  0x2c   :  { %846 = vperm.xlu1 %1987, %v2144_v41   ;;  %vm1469_vm12 = vcmask 1046534   ;;  %vm1472_vm13 = vcmask 1047559   ;;  %s1632_s6 = sshll.u32 %s2072_s1, 4  ;;  %s1633_s6 = int_to_ptr.vmem [resolvable:$true] %s1632_s6 }
  0x2d   :  { %1770 = vmatmul.mubr.msk.f32.vlgmr.msra.gmra.mrb[0].mxu0 %vm75_vm0, %v64_v4  ;;  %s2033_s7 = scalar_lea.vmem %s1633_s6, 128  ;;  %p2038_p3 = scmp.lt.s32.totalorder %s1633_s6, %s1633_s6 }
  0x2e   :  { %1772 = vmatprep.mubr.msk.f32.mxu0 %vm75_vm0, %v65_v5  ;;  %p2034_p2 = scmp.ne.s32.totalorder %s1633_s6, %s2033_s7  ;;  %p2039_p4 = scmp.lt.s32.totalorder %s2033_s7, %s2033_s7 }
  0x2f   :  { %220 = vperm.xlu0 %1986, %v44_v13  }
  0x30   :  { %p2040_p5 = por %p2039_p4, %p2038_p3 }
  0x31   :  { %1773 = vmatmul.mubr.msk.f32.gmra.mrb[2].mxu0 %vm75_vm0, %v66_v6 }
  0x32   :  { %1775 = vmatprep.mubr.msk.f32.mxu0 %vm75_vm0, %v67_v7  ;;  %p2041_p6 = pnand %p2040_p5, %p2034_p2 }
  0x33   :  { %1988 = vset.pattern.permute.xlu0 %v2069_v42 }
  0x35   :  { %1776 = vmatmul.mubr.msk.f32.gmra.mrb[4].mxu0 %vm75_vm0, %v68_v8 }
  0x36   :  { %1778 = vmatprep.mubr.msk.f32.mxu0 %vm75_vm0, %v69_v9 }
  0x39   :  { %1779 = vmatmul.mubr.msk.f32.gmra.mrb[6].mxu0 %vm75_vm0, %v70_v10 }
  0x3a   :  { %1783 = vmatprep.mubr.msk.f32.mxu0 %vm223_vm1, %v43_v11 }
  0xaa   :  { %v2147_v43 = vpop.permute.xlu0 %215 }
  0xae   :  { %v2149_v44 = vpop.permute.xlu0 %220 }
 0x100   :  { %v1771_v15 = vpop.f32.mrb[0].mxu0 }
 0x101   :  { %v166_v16 = vpop.f32.mrb[1].mxu0  ;;  %v172_v17 = vadd.f32 %v1771_v15, %v1645_v14 }
 0x102   :  { %v167_v18 = vadd.f32 %v1645_v14, %v166_v16 }
 0x103   :  { %v206_v22 = vmax.f32 %v172_v17, 0.0 }
 0x104   :  { %v205_v19 = vmax.f32 %v167_v18, 0.0  ;;  %v1774_v20 = vpop.f32.mrb[2].mxu0 }
 0x105   :  { %v176_v21 = vpop.f32.mrb[3].mxu0  ;;  %v182_v23 = vadd.f32 %v1774_v20, %v1645_v14 }
 0x106   :  { %1781 = vmatprep.subr.mxu0 %v205_v19  ;;  %v177_v24 = vadd.f32 %v1645_v14, %v176_v21 }
 0x107   :  { %1782 = vmatpush3.msra.mxu0 %v205_v19  ;;  %v208_v28 = vmax.f32 %v182_v23, 0.0 }
 0x108   :  { %1784 = vmatmul.mubr.msk.f32.vlgmr.msra.gmra.mrb[8].mxu0 %vm223_vm1, %v44_v13  ;;  %1786 = vmatprep.subr.mxu0 %v206_v22  ;;  %v207_v25 = vmax.f32 %v177_v24, 0.0  ;;  %v1777_v26 = vpop.f32.mrb[4].mxu0 }
 0x109   :  { %1787 = vmatpush3.msra.mxu0 %v206_v22  ;;  %1788 = vmatprep.mubr.msk.f32.mxu0 %vm223_vm1, %v43_v11  ;;  %v186_v27 = vpop.f32.mrb[5].mxu0  ;;  %v192_v29 = vadd.f32 %v1777_v26, %v1645_v14 }
 0x10a   :  { %v187_v30 = vadd.f32 %v1645_v14, %v186_v27  ;;  %1791 = vmatprep.subr.mxu0 %v207_v25 }
 0x10b   :  { %v210_v34 = vmax.f32 %v192_v29, 0.0 }
 0x10c   :  { %1789 = vmatmul.mubr.msk.f32.vlgmr.msra.gmra.mrb[10].mxu0 %vm223_vm1, %v44_v13  ;;  %v209_v31 = vmax.f32 %v187_v30, 0.0  ;;  %v1780_v32 = vpop.f32.mrb[6].mxu0 }
 0x10d   :  { %1792 = vmatpush3.msra.mxu0 %v207_v25  ;;  %1793 = vmatprep.mubr.msk.f32.mxu0 %vm223_vm1, %v43_v11  ;;  %v196_v33 = vpop.f32.mrb[7].mxu0  ;;  %v202_v35 = vadd.f32 %v1780_v32, %v1645_v14 }
 0x10e   :  { %v197_v36 = vadd.f32 %v1645_v14, %v196_v33  ;;  %1796 = vmatprep.subr.mxu0 %v208_v28  ;;  %1801 = vmatprep.subr.mxu1 %v209_v31 }
 0x10f   :  { %1802 = vmatpush3.msra.mxu1 %v209_v31  ;;  %v212_v38 = vmax.f32 %v202_v35, 0.0  ;;  %v46_v35 = vld [vmem:[#allocation5 + $0x30] sm:$0xff] }
 0x110   :  { %1794 = vmatmul.mubr.msk.f32.vlgmr.msra.gmra.mrb[12].mxu0 %vm223_vm1, %v44_v13  ;;  %v211_v37 = vmax.f32 %v197_v36, 0.0  ;;  %1804 = vmatmul.mubr.msk.f32.vlgmr.msra.gmra.mrb[0].mxu1 %vm223_vm1, %v44_v13  ;;  %v47_v36 = vld [vmem:[#allocation5 + $0x38] sm:$0xff] }
 0x111   :  { %1797 = vmatpush3.msra.mxu0 %v208_v28  ;;  %1798 = vmatprep.mubr.msk.f32.mxu0 %vm223_vm1, %v43_v11  ;;  %v1949_v42 = vpack.c.bf16 %v47_v36, %v46_v35 }
 0x112   :  { %1806 = vmatprep.subr.mxu0 %v210_v34  ;;  %1811 = vmatprep.subr.mxu1 %v211_v37 }
 0x113   :  { %1812 = vmatpush3.msra.mxu1 %v211_v37  ;;  %1813 = vmatprep.mubr.msk.f32.mxu1 %vm223_vm1, %v43_v11 }
 0x114   :  { %1799 = vmatmul.mubr.msk.f32.vlgmr.msra.gmra.mrb[14].mxu0 %vm223_vm1, %v44_v13  ;;  %1814 = vmatmul.mubr.msk.f32.vlgmr.msra.gmra.mrb[2].mxu1 %vm223_vm1, %v44_v13 }
 0x115   :  { %1807 = vmatpush3.msra.mxu0 %v210_v34  ;;  %1808 = vmatprep.mubr.msk.f32.mxu0 %vm223_vm1, %v43_v11 }
 0x116   :  { %1816 = vmatprep.subr.mxu0 %v212_v38  ;;  %1916 = vmatprep.subr.bf16.mxu1 %v2066_v39 }
 0x117   :  { %1825 = vmatprep.mubr.msk.f32.mxu1 %vm2067_vm2, %v2068_v40 }
 0x118   :  { %1809 = vmatmul.mubr.msk.f32.vlgmr.msra.gmra.mrb[16].mxu0 %vm223_vm1, %v44_v13 }
 0x119   :  { %1817 = vmatpush3.msra.mxu0 %v212_v38  ;;  %1818 = vmatprep.mubr.msk.f32.mxu0 %vm223_vm1, %v43_v11 }
 0x11a   :  { %1920 = vmatprep.subr.bf16.mxu0 %v2066_v39 }
 0x11c   :  { %1819 = vmatmul.mubr.msk.f32.vlgmr.msra.gmra.mrb[18].mxu0 %vm223_vm1, %v44_v13 }
 0x11d   :  { %1832 = vmatprep.mubr.msk.f32.mxu0 %vm2067_vm2, %v2068_v40 }
 0x1db   :  { %v1785_v45 = vpop.f32.mrb[8].mxu0 }
 0x1dc   :  { %v294_v46 = vpop.f32.mrb[9].mxu0  ;;  %v300_v47 = vadd.f32 %v1785_v45, %v2149_v44  ;;  %v49_v45 = vld [vmem:[#allocation5 + $0x48] sm:$0xff] }
 0x1dd   :  { %v295_v48 = vadd.f32 %v294_v46, %v2147_v43 }
 0x1de   :  { %v829_v49 = vmax.f32 %v300_v47, 0.0  ;;  %v50_v47 = vld [vmem:[#allocation5 + $0x50] sm:$0xff] }
 0x1df   :  { %v828_v50 = vmax.f32 %v295_v48, 0.0  ;;  %v1790_v51 = vpop.f32.mrb[10].mxu0  ;;  %v51_v48 = vld [vmem:[#allocation5 + $0x58] sm:$0xff] }
 0x1e0   :  { %v375_v52 = vadd.f32 %v1790_v51, %v2149_v44  ;;  %v369_v53 = vpop.f32.mrb[11].mxu0  ;;  %v53_v51 = vld [vmem:[#allocation5 + $0x68] sm:$0xff] }
 0x1e1   :  { %v1917_v55 = vpack.c.bf16 %v829_v49, %v828_v50  ;;  %v370_v56 = vadd.f32 %v369_v53, %v2147_v43  ;;  %v1955_v49 = vpack.c.bf16 %v51_v48, %v50_v47  ;;  %v52_v50 = vld [vmem:[#allocation5 + $0x60] sm:$0xff]  ;;  %v55_v53 = vld [vmem:[#allocation5 + $0x78] sm:$0xff]  ;;  %v62_v48 = vld [vmem:[#allocation5 + $0xb0] sm:$0x1] }
 0x1e2   :  { %v831_v57 = vmax.f32 %v375_v52, 0.0  ;;  %v1958_v52 = vpack.c.bf16 %v53_v51, %v52_v50  ;;  %v1478_v50 = vrot.slane %v62_v48, 6 }
 0x1e3   :  { %v830_v58 = vmax.f32 %v370_v56, 0.0  ;;  %v1795_v59 = vpop.f32.mrb[12].mxu0  ;;  %v1805_v60 = vpop.f32.mrb[0].mxu1  ;;  %1919 = vmatpush3.bf16.msk.msra.mxu1 %vm2154_vm5, %v1917_v55  ;;  %v57_v55 = vld [vmem:[#allocation5 + $0x88] sm:$0xff] }
 0x1e4   :  { %v450_v61 = vadd.f32 %v1795_v59, %v2149_v44  ;;  %v444_v62 = vpop.f32.mrb[13].mxu0  ;;  %v600_v63 = vadd.f32 %v1805_v60, %v2149_v44  ;;  %v594_v0 = vpop.f32.mrb[1].mxu1  ;;  %1924 = vmatprep.subr.bf16.mxu1 %v2066_v39  ;;  %v60_v60 = vld [vmem:[#allocation5 + $0xa0] sm:$0xff] }
 0x1e5   :  { %v1921_v1 = vpack.c.bf16 %v831_v57, %v830_v58  ;;  %v445_v2 = vadd.f32 %v444_v62, %v2147_v43  ;;  %v595_v3 = vadd.f32 %v594_v0, %v2147_v43  ;;  %v58_v57 = vld [vmem:[#allocation5 + $0x90] sm:$0xff]  ;;  %v59_v58 = vld [vmem:[#allocation5 + $0x98] sm:$0xff] }
 0x1e6   :  { %v833_v4 = vmax.f32 %v450_v61, 0.0  ;;  %v837_v5 = vmax.f32 %v600_v63, 0.0  ;;  %1826 = vmatmul.mubr.msk.f32.vlgmr.msra.gmra.mrb[4].mxu1 %vm849_vm6, %v2144_v41  ;;  %v1967_v59 = vpack.c.bf16 %v59_v58, %v58_v57  ;;  %v61_v61 = vld [vmem:[#allocation5 + $0xa8] sm:$0xff]  ;;  %v2071_v57 = vmov 1966171168  }
 0x1e7   :  { %v832_v6 = vmax.f32 %v445_v2, 0.0  ;;  %v1800_v7 = vpop.f32.mrb[14].mxu0  ;;  %v836_v8 = vmax.f32 %v595_v3, 0.0  ;;  %1923 = vmatpush3.bf16.msk.msra.mxu0 %vm2154_vm5, %v1921_v1  ;;  %v1815_v9 = vpop.f32.mrb[2].mxu1  ;;  %1839 = vmatprep.mubr.msk.f32.mxu1 %vm2067_vm2, %v2068_v40  ;;  %v1970_v62 = vpack.c.bf16 %v61_v61, %v60_v60  ;;  %v1564_v58 = vunpack.c.l.s4 %v2071_v57 }
 0x1e8   :  { %v525_v10 = vadd.f32 %v1800_v7, %v2149_v44  ;;  %v519_v11 = vpop.f32.mrb[15].mxu0  ;;  %v750_v12 = vadd.f32 %v1815_v9, %v2149_v44  ;;  %v744_v13 = vpop.f32.mrb[3].mxu1  ;;  %1928 = vmatprep.subr.bf16.mxu0 %v2066_v39  ;;  %v1488_v61 = vrot.slane %v62_v48, 1 }
 0x1e9   :  { %v1925_v14 = vpack.c.bf16 %v833_v4, %v832_v6  ;;  %v520_v15 = vadd.f32 %v519_v11, %v2147_v43  ;;  %v1933_v16 = vpack.c.bf16 %v837_v5, %v836_v8  ;;  %v745_v17 = vadd.f32 %v744_v13, %v2147_v43  ;;  %v847_v1 = vpop.permute.xlu1 %846 }
 0x1ea   :  { %v835_v18 = vmax.f32 %v525_v10, 0.0  ;;  %v841_v19 = vmax.f32 %v750_v12, 0.0  ;;  %1833 = vmatmul.mubr.msk.f32.vlgmr.msra.gmra.mrb[20].mxu0 %vm849_vm6, %v2144_v41 }
 0x1eb   :  { %v834_v20 = vmax.f32 %v520_v15, 0.0  ;;  %v1810_v21 = vpop.f32.mrb[16].mxu0  ;;  %1927 = vmatpush3.bf16.msk.msra.mxu1 %vm2154_vm5, %v1925_v14  ;;  %v840_v22 = vmax.f32 %v745_v17, 0.0  ;;  %1846 = vmatprep.mubr.msk.f32.mxu0 %vm2067_vm2, %v2068_v40 }
 0x1ec   :  { %v675_v23 = vadd.f32 %v1810_v21, %v2149_v44  ;;  %v669_v24 = vpop.f32.mrb[17].mxu0  ;;  %1932 = vmatprep.subr.bf16.mxu1 %v2066_v39 }
 0x1ed   :  { %v1929_v25 = vpack.c.bf16 %v835_v18, %v834_v20  ;;  %v670_v26 = vadd.f32 %v669_v24, %v2147_v43  ;;  %v1941_v27 = vpack.c.bf16 %v841_v19, %v840_v22 }
 0x1ee   :  { %v839_v28 = vmax.f32 %v675_v23, 0.0  ;;  %1840 = vmatmul.mubr.msk.f32.vlgmr.msra.gmra.mrb[6].mxu1 %vm849_vm6, %v2144_v41 }
 0x1ef   :  { %v838_v29 = vmax.f32 %v670_v26, 0.0  ;;  %v1820_v30 = vpop.f32.mrb[18].mxu0  ;;  %1931 = vmatpush3.bf16.msk.msra.mxu0 %vm2154_vm5, %v1929_v25  ;;  %1935 = vmatpush3.bf16.msk.msra.mxu1 %vm2154_vm5, %v1933_v16 }
 0x1f0   :  { %v825_v31 = vadd.f32 %v1820_v30, %v2149_v44  ;;  %v819_v32 = vpop.f32.mrb[19].mxu0  ;;  %1936 = vmatprep.subr.bf16.mxu0 %v2066_v39  ;;  %1853 = vmatprep.mubr.msk.f32.mxu1 %vm2067_vm2, %v2068_v40  ;;  %v48_v44 = vld [vmem:[#allocation5 + $0x40] sm:$0xff] }
 0x1f1   :  { %v1937_v33 = vpack.c.bf16 %v839_v28, %v838_v29  ;;  %v820_v34 = vadd.f32 %v819_v32, %v2147_v43  ;;  %1940 = vmatprep.subr.bf16.mxu1 %v2066_v39  ;;  %v1952_v46 = vpack.c.bf16 %v49_v45, %v48_v44 }
 0x1f2   :  { %v843_v37 = vmax.f32 %v825_v31, 0.0  ;;  %1847 = vmatmul.mubr.msk.f32.vlgmr.msra.gmra.mrb[22].mxu0 %vm849_vm6, %v2144_v41  ;;  %1854 = vmatmul.mubr.msk.f32.vlgmr.msra.gmra.mrb[8].mxu1 %vm849_vm6, %v2144_v41 }
 0x1f3   :  { %v842_v38 = vmax.f32 %v820_v34, 0.0  ;;  %1939 = vmatpush3.bf16.msk.msra.mxu0 %vm2154_vm5, %v1937_v33  ;;  %1943 = vmatpush3.bf16.msk.msra.mxu1 %vm2154_vm5, %v1941_v27 }
 0x1f4   :  { %1860 = vmatprep.mubr.msk.f32.mxu0 %vm2067_vm2, %v2068_v40  ;;  %1944 = vmatprep.subr.bf16.mxu0 %v2066_v39 }
 0x1f5   :  { %v1945_v43 = vpack.c.bf16 %v843_v37, %v842_v38  ;;  %1867 = vmatprep.mubr.msk.f32.mxu1 %vm2067_vm2, %v2068_v40  ;;  %1948 = vmatprep.subr.bf16.mxu1 %v2066_v39 }
 0x1f6   :  { %1861 = vmatmul.mubr.msk.f32.vlgmr.msra.gmra.mrb[24].mxu0 %vm849_vm6, %v2144_v41  ;;  %1868 = vmatmul.mubr.msk.f32.vlgmr.msra.gmra.mrb[10].mxu1 %vm849_vm6, %v2144_v41 }
 0x1f7   :  { %1947 = vmatpush3.bf16.msk.msra.mxu0 %vm2154_vm5, %v1945_v43  ;;  %1874 = vmatprep.mubr.msk.f32.mxu0 %vm2067_vm2, %v2068_v40 }
 0x1f8   :  { %1950 = vmatpush3.bf16.msra.mxu1 %v1949_v42  ;;  %1909 = vmatprep.mubr.msk.f32.mxu1 %vm2067_vm2, %v2068_v40  ;;  %v54_v40 = vld [vmem:[#allocation5 + $0x70] sm:$0xff] }
 0x1f9   :  { %1951 = vmatprep.subr.bf16.mxu1 %v2066_v39  ;;  %v1961_v54 = vpack.c.bf16 %v55_v53, %v54_v40  ;;  %v1482_v53 = vrot.slane %v62_v48, 4 }
 0x1fa   :  { %1875 = vmatmul.mubr.msk.f32.vlgmr.msra.gmra.mrb[26].mxu0 %vm849_vm6, %v2144_v41  ;;  %v56_v41 = vld [vmem:[#allocation5 + $0x80] sm:$0xff] }
 0x1fb   :  { %v1964_v56 = vpack.c.bf16 %v57_v55, %v56_v41  ;;  %v1484_v41 = vrot.slane %v62_v48, 3 }
 0x1fc   :  { %1953 = vmatpush3.bf16.msra.mxu1 %v1952_v46 }
 0x1fd   :  { %1954 = vmatprep.subr.bf16.mxu1 %v2066_v39 }
 0x200   :  { %1956 = vmatpush3.bf16.msra.mxu1 %v1955_v49  ;;  %v1476_v49 = vrot.slane %v62_v48, 7 }
 0x201   :  { %1957 = vmatprep.subr.bf16.mxu1 %v2066_v39 }
 0x202   :  { %v1477_v51 = vsel %vm1454_vm7, %v1476_v49, %v62_v48 }
 0x203   :  { %v1479_v40 = vsel %vm1457_vm8, %v1478_v50, %v1477_v51 }
 0x204   :  { %1959 = vmatpush3.bf16.msra.mxu1 %v1958_v52  ;;  %v1480_v52 = vrot.slane %v62_v48, 5 }
 0x205   :  { %1960 = vmatprep.subr.bf16.mxu1 %v2066_v39 }
 0x208   :  { %1962 = vmatpush3.bf16.msra.mxu1 %v1961_v54  ;;  %v1481_v54 = vsel %vm1460_vm9, %v1480_v52, %v1479_v40 }
 0x209   :  { %1963 = vmatprep.subr.bf16.mxu1 %v2066_v39  ;;  %v1483_v55 = vsel %vm1463_vm10, %v1482_v53, %v1481_v54 }
 0x20a   :  { %v1485_v60 = vsel %vm1466_vm11, %v1484_v41, %v1483_v55 }
 0x20c   :  { %1965 = vmatpush3.bf16.msra.mxu1 %v1964_v56  ;;  %v1486_v56 = vrot.slane %v62_v48, 2 }
 0x20d   :  { %1966 = vmatprep.subr.bf16.mxu1 %v2066_v39 }
 0x210   :  { %1968 = vmatpush3.bf16.msra.mxu1 %v1967_v59  ;;  %v1566_v59 = vlaneseq }
 0x211   :  { %1969 = vmatprep.subr.bf16.mxu1 %v2066_v39 }
 0x214   :  { %1971 = vmatpush3.bf16.msra.mxu1 %v1970_v62  ;;  %v1487_v62 = vsel %vm1469_vm12, %v1486_v56, %v1485_v60 }
 0x2b9   :  { %v922_v63 = vpop.f32.mrb[4].mxu1 }
 0x2ba   :  { %v1827_v0 = vpop.f32.mrb[5].mxu1  ;;  %v923_v2 = vadd.f32 %v922_v63, %v847_v1  ;;  %v1565_v63 = vunpack.c.0.s8 %v1564_v58 }
 0x2bb   :  { %v1567_v0 = vshrl.u32 %v1566_v59, 7 }
 0x2bc   :  { %v1437_v6 = vmax.f32 %v923_v2, 0.0 }
 0x2bd   :  { %v995_v3 = vpop.f32.mrb[20].mxu0  ;;  %v1568_v2 = vsub.s32 %v1565_v63, %v1567_v0 }
 0x2be   :  { %v996_v4 = vadd.f32 %v995_v3, %v847_v1  ;;  %v1834_v5 = vpop.f32.mrb[21].mxu0 }
 0x2c0   :  { %v1438_v7 = vmax.f32 %v996_v4, 0.0 }
 0x2c1   :  { %v1068_v8 = vpop.f32.mrb[6].mxu1 }
 0x2c2   :  { %v1453_v9 = vrot.slane %v1438_v7, 7  ;;  %v1069_v10 = vadd.f32 %v1068_v8, %v847_v1  ;;  %v1841_v11 = vpop.f32.mrb[7].mxu1 }
 0x2c4   :  { %v1455_v39 = vsel %vm1454_vm7, %v1453_v9, %v1437_v6  ;;  %v1439_v12 = vmax.f32 %v1069_v10, 0.0 }
 0x2c5   :  { %v1141_v13 = vpop.f32.mrb[22].mxu0  ;;  %v1214_v14 = vpop.f32.mrb[8].mxu1 }
 0x2c6   :  { %v1456_v15 = vrot.slane %v1439_v12, 6  ;;  %v1142_v16 = vadd.f32 %v1141_v13, %v847_v1  ;;  %v1848_v17 = vpop.f32.mrb[23].mxu0  ;;  %v1215_v18 = vadd.f32 %v1214_v14, %v847_v1  ;;  %v1855_v19 = vpop.f32.mrb[9].mxu1 }
 0x2c8   :  { %v1458_v20 = vsel %vm1457_vm8, %v1456_v15, %v1455_v39  ;;  %v1440_v21 = vmax.f32 %v1142_v16, 0.0  ;;  %v1441_v22 = vmax.f32 %v1215_v18, 0.0 }
 0x2c9   :  { %v1287_v23 = vpop.f32.mrb[24].mxu0  ;;  %v1360_v24 = vpop.f32.mrb[10].mxu1 }
 0x2ca   :  { %v1459_v25 = vrot.slane %v1440_v21, 5  ;;  %v1462_v26 = vrot.slane %v1441_v22, 4  ;;  %v1288_v27 = vadd.f32 %v1287_v23, %v847_v1  ;;  %v1862_v28 = vpop.f32.mrb[25].mxu0  ;;  %v1361_v29 = vadd.f32 %v1360_v24, %v847_v1  ;;  %v1869_v30 = vpop.f32.mrb[11].mxu1 }
 0x2cc   :  { %v1461_v31 = vsel %vm1460_vm9, %v1459_v25, %v1458_v20  ;;  %v1442_v32 = vmax.f32 %v1288_v27, 0.0  ;;  %v1443_v33 = vmax.f32 %v1361_v29, 0.0 }
 0x2cd   :  { %v1464_v34 = vsel %vm1463_vm10, %v1462_v26, %v1461_v31  ;;  %v1433_v35 = vpop.f32.mrb[26].mxu0 }
 0x2ce   :  { %v1465_v36 = vrot.slane %v1442_v32, 3  ;;  %v1468_v37 = vrot.slane %v1443_v33, 2  ;;  %v1434_v38 = vadd.f32 %v1433_v35, %v847_v1  ;;  %v1876_v42 = vpop.f32.mrb[27].mxu0  ;;  %v1489_v1 = vsel %vm1472_vm13, %v1488_v61, %v1487_v62 }
 0x2d0   :  { %v1467_v43 = vsel %vm1466_vm11, %v1465_v36, %v1464_v34  ;;  %v1444_v44 = vmax.f32 %v1434_v38, 0.0 }
 0x2d1   :  { %v1470_v45 = vsel %vm1469_vm12, %v1468_v37, %v1467_v43 }
 0x2d2   :  { %v1471_v46 = vrot.slane %v1444_v44, 1 }
 0x2d4   :  { %v1473_v47 = vsel %vm1472_vm13, %v1471_v46, %v1470_v45 }
 0x2d5   :  { %1910 = vmatmul.mubr.f32.vlgmr.msra.gmra.mrb[12].mxu1 %v1473_v47 }
 0x3a8   :  { %v1557_v3 = vpop.f32.mrb[12].mxu1 }
 0x3a9   :  { %v1558_v4 = vadd.f32 %v1557_v3, %v1489_v1  ;;  %v1911_v5 = vpop.f32.mrb[13].mxu1 }
 0x3ab   :  { %v1562_v6 = vcombine.high %v1558_v4, %v1558_v4  ;;  %v1569_v7 = vrot.slane %v1558_v4, %v1568_v2 }
 0x3ad   :  { %v1576_v8 = vrot.slane %v1562_v6, %v1568_v2  ;;  %v1577_v9 = vcombine.high %v1569_v7, %v1569_v7  ;;  %v1585_v10 = vrot.slane %v1569_v7, %v1568_v2  ;;  %1686 = vst.sshfl [vmem:[#allocation7] sm:$0x1 pattern:$0x73625140] %v1569_v7 }
 0x3af   :  { %v1578_v11 = vcombine.high %v1576_v8, %v1576_v8  ;;  %v1592_v39 = vrot.slane %v1576_v8, %v1568_v2  ;;  %v1599_v12 = vrot.slane %v1577_v9, %v1568_v2  ;;  %v1607_v13 = vcombine.high %v1585_v10, %v1585_v10  ;;  %1687 = vst.sshfl [vmem:[#allocation7 + $0x1] sm:$0x1 pattern:$0x73625140] %v1577_v9 }
 0x3b0   :  { %1688 = vst.sshfl [vmem:[#allocation7 + $0x4] sm:$0x1 pattern:$0x73625140] %v1576_v8 }
 0x3b1   :  { %v1606_v14 = vrot.slane %v1578_v11, %v1568_v2  ;;  %v1608_v15 = vcombine.high %v1592_v39, %v1592_v39  ;;  %v1609_v16 = vcombine.high %v1599_v12, %v1599_v12  ;;  %1621 = vst [vmem:[#allocation7 + $0x2] sm:$0x1] %v1607_v13  ;;  %1689 = vst.sshfl [vmem:[#allocation7 + $0x5] sm:$0x1 pattern:$0x73625140] %v1578_v11 }
 0x3b3   :  { %v1610_v17 = vcombine.high %v1606_v14, %v1606_v14  ;;  %1622 = vst [vmem:[#allocation7 + $0x3] sm:$0x1] %v1609_v16  ;;  %1625 = vst [vmem:[#allocation7 + $0x6] sm:$0x1] %v1608_v15 }
 0x3b5   :  { %1626 = vst [vmem:[#allocation7 + $0x7] sm:$0x1] %v1610_v17 }
 0x3b6   :  { %2044 = shalt.err (!%p2041_p6)
}
 0x3b7   :  { %s2045_s10 = scalar_lea.hbm %s2259_s2, 128 }
 0x3b8   :  { %p2046_p7 = scmp.ne.s32.totalorder %s2259_s2, %s2045_s10  ;;  %p2049_p8 = scmp.lt.u32.totalorder %s2045_s10, %s2259_s2 }
 0x3ba   :  { %p2051_p9 = pnand %p2049_p8, %p2046_p7 }
 0x3bc   :  { %2054 = shalt.err (!%p2051_p9)
}
 0x3bd   :  { %s2073_s15 = smov 16   ;;  %s2074_s16 = smov 1  }
 0x3be   :  { %1638 = dma.vmem_to_hbm [thread:$0]  %s1633_s6, 128, %s2259_s2, [#allocation4], %s2073_s15, %s2073_s15, %s2074_s16  }
 0x3bf   :  { %2059 = dma.done.wait [#allocation4], 128  }
 0x3c0   :  { %2060 = vsyncadd [#allocation4], 4294967168 }
 0x3c1   :  { %1642 = vsyncpa [#allocation3], 1 }
 0x3c2   :  { %1643 = vsyncpa [#allocation6], 1 }
 0x3c3   :  { %1644 = vsyncpa [#allocation4], 1 }

</bundles_post_ra>
